<compile_context>
chip_gen: v7x
topology: tpu7x:2x2x1
jax: 0.10.0
libtpu: 0.0.40
codegen_flags: <defaults>
</compile_context>

<pallas_src>
import math

import numpy as np
import jax
import jax.numpy as jnp
from jax.experimental import pallas as pl
from jax.experimental.pallas import tpu as pltpu

G = 5                    # grid intervals
K = 3                    # spline order
S = G + K                # B-spline basis functions per input feature
N_GRID = G + 2 * K + 1   # extended knots per input feature
W = N_GRID - 1           # width of the order-0 indicator basis
N_GC_ROWS = 2 + 3 * K    # packed grid-constant rows per layer
LANE = 128


def _round_up(v, m):
    return ((v + m - 1) // m) * m


# ----------------------------- Pallas kernel --------------------------------
def _kan_layer_body(x, gc, r_rep, w_sp, w_base, compute_dtype):
    """One KANLayer on in-kernel values.
       x:      (TB, in_dim)            f32
       gc:     (2+3K, L_pad)           packed grid constants (t-major lanes)
       r_rep:  (in_dim, L_pad)         0/1 replication matrix
       w_sp:   (L_pad, out_dim)        coef*scale_sp*mask, flattened + 0-padded
       w_base: (in_dim, out_dim)       scale_base * mask
    """
    in_dim = x.shape[1]
    L = r_rep.shape[1]

    # ---- base branch: silu(x) @ w_base (sigmoid on EUP, dot on MXU) --------
    base = x * jax.nn.sigmoid(x)
    acc = jnp.dot(base.astype(compute_dtype), w_base.astype(compute_dtype),
                  preferred_element_type=jnp.float32)

    # ---- spline branch -------------------------------------------------------
    # Replicate x into the t-major flat layout on the (otherwise idle) MXU:
    #   x_rep[b, t*in_dim + i] = x[b, i]   (0 in padded lanes)
    x_rep = jnp.dot(x, r_rep, preferred_element_type=jnp.float32,
                    precision=jax.lax.Precision.HIGHEST)

    g_lo = gc[0:1, :]                                    # g[i, t]
    g_hi = gc[1:2, :]                                    # g[i, t+1]
    # Order-0 indicator: comparisons stay in f32.
    val = jnp.logical_and(x_rep >= g_lo, x_rep < g_hi).astype(compute_dtype)

    x_minus_glo = (x_rep - g_lo).astype(compute_dtype)   # loop-invariant, hoisted
    x_rep_c = x_rep.astype(compute_dtype)
    for p in range(1, K + 1):
        r = 2 + 3 * (p - 1)
        b_p    = gc[r    :r + 1, :].astype(compute_dtype)  # g[i, t+p+1]
        inv_dl = gc[r + 1:r + 2, :].astype(compute_dtype)  # 1/(g[t+p]  -g[t]),   0 in padding
        inv_dr = gc[r + 2:r + 3, :].astype(compute_dtype)  # 1/(g[t+p+1]-g[t+1]), 0 in padding
        # B_{p-1}[i, t+1]: rotate the flat layout left by in_dim lanes (XLU).
        # Wrapped-around lanes land where inv_dr == 0 -> annihilated.
        val_up = pltpu.roll(val, shift=L - in_dim, axis=1)
        val = x_minus_glo * inv_dl * val + (b_p - x_rep_c) * inv_dr * val_up

    # Spline contraction: ONE lane-dense matmul (w_sp zero-padded to L_pad).
    acc = acc + jnp.dot(val, w_sp.astype(compute_dtype),
                        preferred_element_type=jnp.float32)
    return acc


def _make_fused_kernel(n_layers, act_offsets, act_dims, compute_dtype):
    """Kernel chaining n_layers KANLayers; running activation stays on-chip."""
    def kernel(*refs):
        x_ref = refs[0]
        p_refs = refs[1:1 + 4 * n_layers]
        out_ref = refs[1 + 4 * n_layers]
        out_ref[...] = jnp.zeros_like(out_ref)          # zero the padded slab
        h = x_ref[...]
        for l in range(n_layers):
            gc     = p_refs[4 * l][...]
            r_rep  = p_refs[4 * l + 1][...]
            w_sp   = p_refs[4 * l + 2][...]
            w_base = p_refs[4 * l + 3][...]
            h = _kan_layer_body(h, gc, r_rep, w_sp, w_base, compute_dtype)
            off, d = act_offsets[l], act_dims[l]
            out_ref[:, off:off + d] = h.astype(out_ref.dtype)
    return kernel


def _pick_batch_tile(B):
    cap = min(B, 512)                 # big tiles amortize ~0.35us/step overhead
    if B >= 16:
        cap = min(cap, B // 2)        # >=2 grid steps -> both v7x TensorCores
    for t in range(cap, 0, -1):
        if B % t == 0 and (t % 8 == 0 or t == B):
            return t
    return B


def simple_kan_forward(x, packed_params, *, batch_tile=None,
                       compute_dtype=jnp.float32):
    """SimpleKAN.forward: fused chain of KANLayers.
    Returns (out, acts) with acts = [x, act_layer1, ..., act_layerN].
    preacts/postacts/postspline are deleted in the reference forward, so they
    are not produced. compute_dtype=jnp.bfloat16 is an opt-in for v6e/v7x."""
    B, in0 = x.shape
    n = len(packed_params)
    if batch_tile is None:
        batch_tile = _pick_batch_tile(B)
    assert B % batch_tile == 0

    in_specs = [pl.BlockSpec((batch_tile, in0), lambda i: (i, 0))]
    flat_params = []
    for layer_params in packed_params:            # (gc, r_rep, w_sp, w_base)
        for p in layer_params:
            in_specs.append(pl.BlockSpec(p.shape, lambda i: (0, 0)))
            flat_params.append(p)

    out_dims = [lp[3].shape[1] for lp in packed_params]
    offsets, off = [], 0
    for d in out_dims:
        offsets.append(off)
        off += d
    slab = max(LANE, _round_up(off, LANE))        # lane-dense activation slab

    # Advisory cost estimate for the XLA scheduler around the custom call.
    flops, transc, bytes_acc = 0, 0, x.size * 4
    for gc, r_rep, w_sp, w_base in packed_params:
        in_d, L = r_rep.shape
        out_d = w_base.shape[1]
        flops += 2 * B * in_d * L                 # replication matmul
        flops += 2 * B * in_d * out_d             # base matmul
        flops += 2 * B * L * out_d                # spline matmul
        flops += 6 * B * L * K                    # Cox-de Boor recursion (VALU)
        transc += B * in_d                        # sigmoid (EUP)
        bytes_acc += 4 * (gc.size + r_rep.size + w_sp.size + w_base.size)
    bytes_acc += 4 * B * slab

    slab_out = pl.pallas_call(
        _make_fused_kernel(n, offsets, out_dims, compute_dtype),
        out_shape=jax.ShapeDtypeStruct((B, slab), jnp.float32),
        grid=(B // batch_tile,),
        in_specs=in_specs,
        out_specs=pl.BlockSpec((batch_tile, slab), lambda i: (i, 0)),
        compiler_params=pltpu.CompilerParams(
            dimension_semantics=("parallel",),     # batch axis -> both TCs on v7x
            vmem_limit_bytes=32 * 1024 * 1024),
        cost_estimate=pl.CostEstimate(flops=flops, transcendentals=transc,
                                      bytes_accessed=bytes_acc),
    )(x, *flat_params)

    acts = [x]
    for d, o in zip(out_dims, offsets):
        acts.append(slab_out[:, o:o + d])
    return acts[-1], acts


# ------------------------- parameter setup (glue) ---------------------------
def init_kan_layer(key, in_dim, out_dim):
    """Deterministic synthetic init, pykan-style shapes, scales folded in."""
    k_coef, k_sb = jax.random.split(key)
    h = 2.0 / G
    base_grid = jnp.arange(-K, G + K + 1, dtype=jnp.float32) * h - 1.0   # (N_GRID,)
    grid = jnp.tile(base_grid[None, :], (in_dim, 1))                     # (in_dim, N_GRID)

    coef = 0.1 * jax.random.normal(k_coef, (in_dim, out_dim, S), dtype=jnp.float32)
    scale_base = (1.0 / math.sqrt(in_dim)) * (
        1.0 + 0.1 * (jax.random.uniform(k_sb, (in_dim, out_dim), jnp.float32) * 2.0 - 1.0))
    scale_sp = jnp.full((in_dim, out_dim), 1.0 / math.sqrt(in_dim), jnp.float32)
    mask = jnp.ones((in_dim, out_dim), jnp.float32)

    w_sp3 = jnp.transpose(coef, (0, 2, 1)) * (scale_sp * mask)[:, None, :]  # (in,S,out)
    w_base = scale_base * mask                                              # (in,out)
    return grid, w_sp3.astype(jnp.float32), w_base.astype(jnp.float32)


def pack_layer(grid, w_sp3, w_base):
    """Host-side packing into kernel format: t-major flat lanes, zero-padded to
    a multiple of 128, grid reciprocals precomputed (0 where knots coincide)."""
    grid = np.asarray(grid, np.float32)
    w_sp3 = np.asarray(w_sp3, np.float32)
    w_base = np.asarray(w_base, np.float32)
    in_dim, n_grid = grid.shape
    assert n_grid == N_GRID
    out_dim = w_base.shape[1]
    L = W * in_dim
    L_pad = _round_up(L, LANE)

    def flat(vals_it):
        # vals_it: (in_dim, Wv<=W) -> (1, L_pad) with entry[t*in_dim+i], 0-padded.
        wv = vals_it.shape[1]
        padded = np.zeros((in_dim, W), np.float32)
        padded[:, :wv] = vals_it
        row = np.zeros((1, L_pad), np.float32)
        row[0, :L] = padded.T.reshape(-1)
        return row

    rows = [flat(grid[:, :-1]),      # g[i, t]
            flat(grid[:, 1:])]       # g[i, t+1]
    for p in range(1, K + 1):
        dl = grid[:, p:-1] - grid[:, :-(p + 1)]      # g[t+p]   - g[t]
        dr = grid[:, p + 1:] - grid[:, 1:-p]         # g[t+p+1] - g[t+1]
        b_p = grid[:, p + 1:]                        # g[t+p+1]
        inv_dl = np.where(dl != 0, 1.0 / dl, 0.0)    # 0 ~ pykan's nan_to_num
        inv_dr = np.where(dr != 0, 1.0 / dr, 0.0)
        rows += [flat(b_p), flat(inv_dl), flat(inv_dr)]
    gc = np.concatenate(rows, axis=0)                            # (2+3K, L_pad)

    # 0/1 replication matrix: (x @ r_rep)[b, t*in_dim + i] = x[b, i]
    r_rep = np.zeros((in_dim, L_pad), np.float32)
    r_rep[:, :L] = np.tile(np.eye(in_dim, dtype=np.float32), (1, W))

    # spline weight, row t*in_dim + i == w_sp3[i, t, :], zero-padded to L_pad
    w_sp_flat = np.zeros((L_pad, out_dim), np.float32)
    w_sp_flat[:S * in_dim, :] = np.transpose(w_sp3, (1, 0, 2)).reshape(S * in_dim, out_dim)

    return (jnp.asarray(gc), jnp.asarray(r_rep),
            jnp.asarray(w_sp_flat), jnp.asarray(w_base))


# -------------------------- pure-JAX reference ------------------------------
def _kan_layer_ref(x, grid, w_sp3, w_base):
    base = x * jax.nn.sigmoid(x)
    xe = x[:, :, None]
    g = grid[None, :, :]
    val = jnp.logical_and(xe >= g[:, :, :-1], xe < g[:, :, 1:]).astype(jnp.float32)
    for p in range(1, K + 1):
        left = (xe - g[:, :, :-(p + 1)]) / (g[:, :, p:-1] - g[:, :, :-(p + 1)])
        right = (g[:, :, p + 1:] - xe) / (g[:, :, p + 1:] - g[:, :, 1:-p])
        val = left * val[:, :, :-1] + right * val[:, :, 1:]
    return base @ w_base + jnp.einsum("bis,iso->bo", val, w_sp3)


# TODO(synk): train_pykan / fit / update_grid_from_samples / save / load are
# host-side training & I/O loops with no kernel equivalent; only forward().

if __name__ == "__main__":
    key = jax.random.PRNGKey(0)
    k_x, k_l1, k_l2 = jax.random.split(key, 3)

    B = 16
    dims = [8, 32, 8]                       # KANLayer(8->32), KANLayer(32->8)
    x = jax.random.uniform(k_x, (B, dims[0]), jnp.float32, minval=-1.0, maxval=1.0)

    raw_params = [
        init_kan_layer(k_l1, dims[0], dims[1]),
        init_kan_layer(k_l2, dims[1], dims[2]),
    ]
    packed_params = [pack_layer(*p) for p in raw_params]

    out, acts = simple_kan_forward(x, packed_params)   # grid=(2,) with tile=8
    out = jax.block_until_ready(out)

    # reference chain (pykan formulation)
    ref_acts = [x]
    r = x
    for p in raw_params:
        r = _kan_layer_ref(r, *p)
        ref_acts.append(r)

    for a, rr in zip(acts[1:], ref_acts[1:]):
        if not bool(jnp.allclose(a, rr, rtol=1e-4, atol=2e-5)):
            raise AssertionError("Pallas KAN output does not match JAX reference")

    print("KERNEL_OK")
</pallas_src>

<mosaic_0001>
module attributes {stable_mosaic.version = 11 : i64} {
  func.func @kernel(%arg0: i32, %arg1: memref<8x8xf32, #tpu.memory_space<vmem>>, %arg2: memref<11x128xf32, #tpu.memory_space<vmem>>, %arg3: memref<8x128xf32, #tpu.memory_space<vmem>>, %arg4: memref<128x32xf32, #tpu.memory_space<vmem>>, %arg5: memref<8x32xf32, #tpu.memory_space<vmem>>, %arg6: memref<11x384xf32, #tpu.memory_space<vmem>>, %arg7: memref<32x384xf32, #tpu.memory_space<vmem>>, %arg8: memref<384x8xf32, #tpu.memory_space<vmem>>, %arg9: memref<32x8xf32, #tpu.memory_space<vmem>>, %arg10: memref<8x128xf32, #tpu.memory_space<vmem>>) attributes {dimension_semantics = [#tpu.dimension_semantics<parallel>], iteration_bounds = array<i64: 2>, scalar_prefetch = 0 : i64, scratch_operands = 0 : i64, tpu.core_type = #tpu.core_type<tc>, window_params = [{transform_indices = @transform_0, window_bounds = array<i64: 8, 8>}, {pipeline_mode = #tpu.pipeline_mode<synchronous>, transform_indices = @transform_1, window_bounds = array<i64: 11, 128>}, {pipeline_mode = #tpu.pipeline_mode<synchronous>, transform_indices = @transform_2, window_bounds = array<i64: 8, 128>}, {pipeline_mode = #tpu.pipeline_mode<synchronous>, transform_indices = @transform_3, window_bounds = array<i64: 128, 32>}, {pipeline_mode = #tpu.pipeline_mode<synchronous>, transform_indices = @transform_4, window_bounds = array<i64: 8, 32>}, {pipeline_mode = #tpu.pipeline_mode<synchronous>, transform_indices = @transform_5, window_bounds = array<i64: 11, 384>}, {pipeline_mode = #tpu.pipeline_mode<synchronous>, transform_indices = @transform_6, window_bounds = array<i64: 32, 384>}, {pipeline_mode = #tpu.pipeline_mode<synchronous>, transform_indices = @transform_7, window_bounds = array<i64: 384, 8>}, {pipeline_mode = #tpu.pipeline_mode<synchronous>, transform_indices = @transform_8, window_bounds = array<i64: 32, 8>}, {transform_indices = @transform_9, window_bounds = array<i64: 8, 128>}]} {
    %cst = arith.constant 0.000000e+00 : f32
    %0 = vector.broadcast %cst : f32 to vector<8x128xf32>
    %c0 = arith.constant 0 : index
    %c0_0 = arith.constant 0 : index
    %1 = vector.load %arg10[%c0, %c0_0] : memref<8x128xf32, #tpu.memory_space<vmem>>, vector<8x128xf32>
    tpu.vector_store %arg10[%c0, %c0_0], %0 {strides = array<i32>} : memref<8x128xf32, #tpu.memory_space<vmem>>, vector<8x128xf32>,
    %c0_1 = arith.constant 0 : index
    %c0_2 = arith.constant 0 : index
    %2 = vector.load %arg1[%c0_1, %c0_2] : memref<8x8xf32, #tpu.memory_space<vmem>>, vector<8x8xf32>
    %c0_3 = arith.constant 0 : index
    %c0_4 = arith.constant 0 : index
    %3 = vector.load %arg2[%c0_3, %c0_4] : memref<11x128xf32, #tpu.memory_space<vmem>>, vector<11x128xf32>
    %c0_5 = arith.constant 0 : index
    %c0_6 = arith.constant 0 : index
    %4 = vector.load %arg3[%c0_5, %c0_6] : memref<8x128xf32, #tpu.memory_space<vmem>>, vector<8x128xf32>
    %c0_7 = arith.constant 0 : index
    %c0_8 = arith.constant 0 : index
    %5 = vector.load %arg4[%c0_7, %c0_8] : memref<128x32xf32, #tpu.memory_space<vmem>>, vector<128x32xf32>
    %c0_9 = arith.constant 0 : index
    %c0_10 = arith.constant 0 : index
    %6 = vector.load %arg5[%c0_9, %c0_10] : memref<8x32xf32, #tpu.memory_space<vmem>>, vector<8x32xf32>
    %7 = arith.negf %2 : vector<8x8xf32>
    %8 = math.exp %7 : vector<8x8xf32>
    %cst_11 = arith.constant 1.000000e+00 : f32
    %9 = vector.broadcast %cst_11 : f32 to vector<8x8xf32>
    %10 = arith.addf %9, %8 : vector<8x8xf32>
    %11 = arith.divf %9, %10 : vector<8x8xf32>
    %12 = arith.mulf %2, %11 : vector<8x8xf32>
    %cst_12 = arith.constant dense<0.000000e+00> : vector<8x32xf32>
    %13 = tpu.matmul %12, %6, %cst_12 {dimension_numbers = #tpu.dot_dimension_numbers<[1], [0], [0], [1], [0, 0, 1, 1], [], []>} : vector<8x8xf32>, vector<8x32xf32>, vector<8x32xf32> -> vector<8x32xf32>
    %cst_13 = arith.constant dense<0.000000e+00> : vector<8x128xf32>
    %14 = tpu.matmul %2, %4, %cst_13 {dimension_numbers = #tpu.dot_dimension_numbers<[1], [0], [0], [1], [0, 0, 1, 1], [], []>, precision = #tpu.contract_precision<fp32>} : vector<8x8xf32>, vector<8x128xf32>, vector<8x128xf32> -> vector<8x128xf32>
    %15 = vector.extract_strided_slice %3 {offsets = [0, 0], sizes = [1, 128], strides = [1, 1]} : vector<11x128xf32> to vector<1x128xf32>
    %16 = vector.extract_strided_slice %3 {offsets = [1, 0], sizes = [1, 128], strides = [1, 1]} : vector<11x128xf32> to vector<1x128xf32>
    %17 = vector.broadcast %15 : vector<1x128xf32> to vector<8x128xf32>
    %18 = arith.cmpf oge, %14, %17 : vector<8x128xf32>
    %19 = vector.broadcast %16 : vector<1x128xf32> to vector<8x128xf32>
    %20 = arith.cmpf olt, %14, %19 : vector<8x128xf32>
    %21 = arith.andi %18, %20 : vector<8x128xi1>
    %22 = arith.extui %21 : vector<8x128xi1> to vector<8x128xi32>
    %23 = arith.sitofp %22 : vector<8x128xi32> to vector<8x128xf32>
    %24 = vector.broadcast %15 : vector<1x128xf32> to vector<8x128xf32>
    %25 = arith.subf %14, %24 : vector<8x128xf32>
    %26 = vector.extract_strided_slice %3 {offsets = [2, 0], sizes = [1, 128], strides = [1, 1]} : vector<11x128xf32> to vector<1x128xf32>
    %27 = vector.extract_strided_slice %3 {offsets = [3, 0], sizes = [1, 128], strides = [1, 1]} : vector<11x128xf32> to vector<1x128xf32>
    %28 = vector.extract_strided_slice %3 {offsets = [4, 0], sizes = [1, 128], strides = [1, 1]} : vector<11x128xf32> to vector<1x128xf32>
    %c120_i32 = arith.constant 120 : i32
    %29 = tpu.dynamic_rotate %23 by %c120_i32 dim 1 : vector<8x128xf32>, i32 -> vector<8x128xf32>
    %30 = vector.broadcast %27 : vector<1x128xf32> to vector<8x128xf32>
    %31 = arith.mulf %25, %30 : vector<8x128xf32>
    %32 = arith.mulf %31, %23 : vector<8x128xf32>
    %33 = vector.broadcast %26 : vector<1x128xf32> to vector<8x128xf32>
    %34 = arith.subf %33, %14 : vector<8x128xf32>
    %35 = vector.broadcast %28 : vector<1x128xf32> to vector<8x128xf32>
    %36 = arith.mulf %34, %35 : vector<8x128xf32>
    %37 = arith.mulf %36, %29 : vector<8x128xf32>
    %38 = arith.addf %32, %37 : vector<8x128xf32>
    %39 = vector.extract_strided_slice %3 {offsets = [5, 0], sizes = [1, 128], strides = [1, 1]} : vector<11x128xf32> to vector<1x128xf32>
    %40 = vector.extract_strided_slice %3 {offsets = [6, 0], sizes = [1, 128], strides = [1, 1]} : vector<11x128xf32> to vector<1x128xf32>
    %41 = vector.extract_strided_slice %3 {offsets = [7, 0], sizes = [1, 128], strides = [1, 1]} : vector<11x128xf32> to vector<1x128xf32>
    %c120_i32_14 = arith.constant 120 : i32
    %42 = tpu.dynamic_rotate %38 by %c120_i32_14 dim 1 : vector<8x128xf32>, i32 -> vector<8x128xf32>
    %43 = vector.broadcast %40 : vector<1x128xf32> to vector<8x128xf32>
    %44 = arith.mulf %25, %43 : vector<8x128xf32>
    %45 = arith.mulf %44, %38 : vector<8x128xf32>
    %46 = vector.broadcast %39 : vector<1x128xf32> to vector<8x128xf32>
    %47 = arith.subf %46, %14 : vector<8x128xf32>
    %48 = vector.broadcast %41 : vector<1x128xf32> to vector<8x128xf32>
    %49 = arith.mulf %47, %48 : vector<8x128xf32>
    %50 = arith.mulf %49, %42 : vector<8x128xf32>
    %51 = arith.addf %45, %50 : vector<8x128xf32>
    %52 = vector.extract_strided_slice %3 {offsets = [8, 0], sizes = [1, 128], strides = [1, 1]} : vector<11x128xf32> to vector<1x128xf32>
    %53 = vector.extract_strided_slice %3 {offsets = [9, 0], sizes = [1, 128], strides = [1, 1]} : vector<11x128xf32> to vector<1x128xf32>
    %54 = vector.extract_strided_slice %3 {offsets = [10, 0], sizes = [1, 128], strides = [1, 1]} : vector<11x128xf32> to vector<1x128xf32>
    %c120_i32_15 = arith.constant 120 : i32
    %55 = tpu.dynamic_rotate %51 by %c120_i32_15 dim 1 : vector<8x128xf32>, i32 -> vector<8x128xf32>
    %56 = vector.broadcast %53 : vector<1x128xf32> to vector<8x128xf32>
    %57 = arith.mulf %25, %56 : vector<8x128xf32>
    %58 = arith.mulf %57, %51 : vector<8x128xf32>
    %59 = vector.broadcast %52 : vector<1x128xf32> to vector<8x128xf32>
    %60 = arith.subf %59, %14 : vector<8x128xf32>
    %61 = vector.broadcast %54 : vector<1x128xf32> to vector<8x128xf32>
    %62 = arith.mulf %60, %61 : vector<8x128xf32>
    %63 = arith.mulf %62, %55 : vector<8x128xf32>
    %64 = arith.addf %58, %63 : vector<8x128xf32>
    %cst_16 = arith.constant dense<0.000000e+00> : vector<8x32xf32>
    %65 = tpu.matmul %64, %5, %cst_16 {dimension_numbers = #tpu.dot_dimension_numbers<[1], [0], [0], [1], [0, 0, 1, 1], [], []>} : vector<8x128xf32>, vector<128x32xf32>, vector<8x32xf32> -> vector<8x32xf32>
    %66 = arith.addf %13, %65 : vector<8x32xf32>
    %c0_17 = arith.constant 0 : index
    %c0_18 = arith.constant 0 : index
    %67 = vector.load %arg10[%c0_17, %c0_18] : memref<8x128xf32, #tpu.memory_space<vmem>>, vector<8x32xf32>
    tpu.vector_store %arg10[%c0_17, %c0_18], %66 {strides = array<i32>} : memref<8x128xf32, #tpu.memory_space<vmem>>, vector<8x32xf32>,
    %c0_19 = arith.constant 0 : index
    %c0_20 = arith.constant 0 : index
    %68 = vector.load %arg6[%c0_19, %c0_20] : memref<11x384xf32, #tpu.memory_space<vmem>>, vector<11x384xf32>
    %c0_21 = arith.constant 0 : index
    %c0_22 = arith.constant 0 : index
    %69 = vector.load %arg7[%c0_21, %c0_22] : memref<32x384xf32, #tpu.memory_space<vmem>>, vector<32x384xf32>
    %c0_23 = arith.constant 0 : index
    %c0_24 = arith.constant 0 : index
    %70 = vector.load %arg8[%c0_23, %c0_24] : memref<384x8xf32, #tpu.memory_space<vmem>>, vector<384x8xf32>
    %c0_25 = arith.constant 0 : index
    %c0_26 = arith.constant 0 : index
    %71 = vector.load %arg9[%c0_25, %c0_26] : memref<32x8xf32, #tpu.memory_space<vmem>>, vector<32x8xf32>
    %72 = arith.negf %66 : vector<8x32xf32>
    %73 = math.exp %72 : vector<8x32xf32>
    %cst_27 = arith.constant 1.000000e+00 : f32
    %74 = vector.broadcast %cst_27 : f32 to vector<8x32xf32>
    %75 = arith.addf %74, %73 : vector<8x32xf32>
    %76 = arith.divf %74, %75 : vector<8x32xf32>
    %77 = arith.mulf %66, %76 : vector<8x32xf32>
    %cst_28 = arith.constant dense<0.000000e+00> : vector<8x8xf32>
    %78 = tpu.matmul %77, %71, %cst_28 {dimension_numbers = #tpu.dot_dimension_numbers<[1], [0], [0], [1], [0, 0, 1, 1], [], []>} : vector<8x32xf32>, vector<32x8xf32>, vector<8x8xf32> -> vector<8x8xf32>
    %cst_29 = arith.constant dense<0.000000e+00> : vector<8x384xf32>
    %79 = tpu.matmul %66, %69, %cst_29 {dimension_numbers = #tpu.dot_dimension_numbers<[1], [0], [0], [1], [0, 0, 1, 1], [], []>, precision = #tpu.contract_precision<fp32>} : vector<8x32xf32>, vector<32x384xf32>, vector<8x384xf32> -> vector<8x384xf32>
    %80 = vector.extract_strided_slice %68 {offsets = [0, 0], sizes = [1, 384], strides = [1, 1]} : vector<11x384xf32> to vector<1x384xf32>
    %81 = vector.extract_strided_slice %68 {offsets = [1, 0], sizes = [1, 384], strides = [1, 1]} : vector<11x384xf32> to vector<1x384xf32>
    %82 = vector.broadcast %80 : vector<1x384xf32> to vector<8x384xf32>
    %83 = arith.cmpf oge, %79, %82 : vector<8x384xf32>
    %84 = vector.broadcast %81 : vector<1x384xf32> to vector<8x384xf32>
    %85 = arith.cmpf olt, %79, %84 : vector<8x384xf32>
    %86 = arith.andi %83, %85 : vector<8x384xi1>
    %87 = arith.extui %86 : vector<8x384xi1> to vector<8x384xi32>
    %88 = arith.sitofp %87 : vector<8x384xi32> to vector<8x384xf32>
    %89 = vector.broadcast %80 : vector<1x384xf32> to vector<8x384xf32>
    %90 = arith.subf %79, %89 : vector<8x384xf32>
    %91 = vector.extract_strided_slice %68 {offsets = [2, 0], sizes = [1, 384], strides = [1, 1]} : vector<11x384xf32> to vector<1x384xf32>
    %92 = vector.extract_strided_slice %68 {offsets = [3, 0], sizes = [1, 384], strides = [1, 1]} : vector<11x384xf32> to vector<1x384xf32>
    %93 = vector.extract_strided_slice %68 {offsets = [4, 0], sizes = [1, 384], strides = [1, 1]} : vector<11x384xf32> to vector<1x384xf32>
    %c352_i32 = arith.constant 352 : i32
    %94 = tpu.dynamic_rotate %88 by %c352_i32 dim 1 : vector<8x384xf32>, i32 -> vector<8x384xf32>
    %95 = vector.broadcast %92 : vector<1x384xf32> to vector<8x384xf32>
    %96 = arith.mulf %90, %95 : vector<8x384xf32>
    %97 = arith.mulf %96, %88 : vector<8x384xf32>
    %98 = vector.broadcast %91 : vector<1x384xf32> to vector<8x384xf32>
    %99 = arith.subf %98, %79 : vector<8x384xf32>
    %100 = vector.broadcast %93 : vector<1x384xf32> to vector<8x384xf32>
    %101 = arith.mulf %99, %100 : vector<8x384xf32>
    %102 = arith.mulf %101, %94 : vector<8x384xf32>
    %103 = arith.addf %97, %102 : vector<8x384xf32>
    %104 = vector.extract_strided_slice %68 {offsets = [5, 0], sizes = [1, 384], strides = [1, 1]} : vector<11x384xf32> to vector<1x384xf32>
    %105 = vector.extract_strided_slice %68 {offsets = [6, 0], sizes = [1, 384], strides = [1, 1]} : vector<11x384xf32> to vector<1x384xf32>
    %106 = vector.extract_strided_slice %68 {offsets = [7, 0], sizes = [1, 384], strides = [1, 1]} : vector<11x384xf32> to vector<1x384xf32>
    %c352_i32_30 = arith.constant 352 : i32
    %107 = tpu.dynamic_rotate %103 by %c352_i32_30 dim 1 : vector<8x384xf32>, i32 -> vector<8x384xf32>
    %108 = vector.broadcast %105 : vector<1x384xf32> to vector<8x384xf32>
    %109 = arith.mulf %90, %108 : vector<8x384xf32>
    %110 = arith.mulf %109, %103 : vector<8x384xf32>
    %111 = vector.broadcast %104 : vector<1x384xf32> to vector<8x384xf32>
    %112 = arith.subf %111, %79 : vector<8x384xf32>
    %113 = vector.broadcast %106 : vector<1x384xf32> to vector<8x384xf32>
    %114 = arith.mulf %112, %113 : vector<8x384xf32>
    %115 = arith.mulf %114, %107 : vector<8x384xf32>
    %116 = arith.addf %110, %115 : vector<8x384xf32>
    %117 = vector.extract_strided_slice %68 {offsets = [8, 0], sizes = [1, 384], strides = [1, 1]} : vector<11x384xf32> to vector<1x384xf32>
    %118 = vector.extract_strided_slice %68 {offsets = [9, 0], sizes = [1, 384], strides = [1, 1]} : vector<11x384xf32> to vector<1x384xf32>
    %119 = vector.extract_strided_slice %68 {offsets = [10, 0], sizes = [1, 384], strides = [1, 1]} : vector<11x384xf32> to vector<1x384xf32>
    %c352_i32_31 = arith.constant 352 : i32
    %120 = tpu.dynamic_rotate %116 by %c352_i32_31 dim 1 : vector<8x384xf32>, i32 -> vector<8x384xf32>
    %121 = vector.broadcast %118 : vector<1x384xf32> to vector<8x384xf32>
    %122 = arith.mulf %90, %121 : vector<8x384xf32>
    %123 = arith.mulf %122, %116 : vector<8x384xf32>
    %124 = vector.broadcast %117 : vector<1x384xf32> to vector<8x384xf32>
    %125 = arith.subf %124, %79 : vector<8x384xf32>
    %126 = vector.broadcast %119 : vector<1x384xf32> to vector<8x384xf32>
    %127 = arith.mulf %125, %126 : vector<8x384xf32>
    %128 = arith.mulf %127, %120 : vector<8x384xf32>
    %129 = arith.addf %123, %128 : vector<8x384xf32>
    %cst_32 = arith.constant dense<0.000000e+00> : vector<8x8xf32>
    %130 = tpu.matmul %129, %70, %cst_32 {dimension_numbers = #tpu.dot_dimension_numbers<[1], [0], [0], [1], [0, 0, 1, 1], [], []>} : vector<8x384xf32>, vector<384x8xf32>, vector<8x8xf32> -> vector<8x8xf32>
    %131 = arith.addf %78, %130 : vector<8x8xf32>
    %c0_33 = arith.constant 0 : index
    %c32 = arith.constant 32 : index
    %132 = vector.load %arg10[%c0_33, %c32] : memref<8x128xf32, #tpu.memory_space<vmem>>, vector<8x8xf32>
    tpu.vector_store %arg10[%c0_33, %c32], %131 {strides = array<i32>} : memref<8x128xf32, #tpu.memory_space<vmem>>, vector<8x8xf32>,
    return
  }
  func.func @transform_0(%arg0: i32) -> (i32, i32) {
    %c0_i32 = arith.constant 0 : i32
    %c0_i32_0 = arith.constant 0 : i32
    return %arg0, %c0_i32 : i32, i32
  }
  func.func @transform_1(%arg0: i32) -> (i32, i32) {
    %c0_i32 = arith.constant 0 : i32
    %c0_i32_0 = arith.constant 0 : i32
    %c0_i32_1 = arith.constant 0 : i32
    return %c0_i32, %c0_i32_0 : i32, i32
  }
  func.func @transform_2(%arg0: i32) -> (i32, i32) {
    %c0_i32 = arith.constant 0 : i32
    %c0_i32_0 = arith.constant 0 : i32
    %c0_i32_1 = arith.constant 0 : i32
    return %c0_i32, %c0_i32_0 : i32, i32
  }
  func.func @transform_3(%arg0: i32) -> (i32, i32) {
    %c0_i32 = arith.constant 0 : i32
    %c0_i32_0 = arith.constant 0 : i32
    %c0_i32_1 = arith.constant 0 : i32
    return %c0_i32, %c0_i32_0 : i32, i32
  }
  func.func @transform_4(%arg0: i32) -> (i32, i32) {
    %c0_i32 = arith.constant 0 : i32
    %c0_i32_0 = arith.constant 0 : i32
    %c0_i32_1 = arith.constant 0 : i32
    return %c0_i32, %c0_i32_0 : i32, i32
  }
  func.func @transform_5(%arg0: i32) -> (i32, i32) {
    %c0_i32 = arith.constant 0 : i32
    %c0_i32_0 = arith.constant 0 : i32
    %c0_i32_1 = arith.constant 0 : i32
    return %c0_i32, %c0_i32_0 : i32, i32
  }
  func.func @transform_6(%arg0: i32) -> (i32, i32) {
    %c0_i32 = arith.constant 0 : i32
    %c0_i32_0 = arith.constant 0 : i32
    %c0_i32_1 = arith.constant 0 : i32
    return %c0_i32, %c0_i32_0 : i32, i32
  }
  func.func @transform_7(%arg0: i32) -> (i32, i32) {
    %c0_i32 = arith.constant 0 : i32
    %c0_i32_0 = arith.constant 0 : i32
    %c0_i32_1 = arith.constant 0 : i32
    return %c0_i32, %c0_i32_0 : i32, i32
  }
  func.func @transform_8(%arg0: i32) -> (i32, i32) {
    %c0_i32 = arith.constant 0 : i32
    %c0_i32_0 = arith.constant 0 : i32
    %c0_i32_1 = arith.constant 0 : i32
    return %c0_i32, %c0_i32_0 : i32, i32
  }
  func.func @transform_9(%arg0: i32) -> (i32, i32) {
    %c0_i32 = arith.constant 0 : i32
    %c0_i32_0 = arith.constant 0 : i32
    return %arg0, %c0_i32 : i32, i32
  }
}

</mosaic_0001>

<bundles_post_ra>
// kernel: tpu_custom_call.1
= control target key start
LH: loop header
LB: loop body
LE: loop exit
PB: predicated region body
PF: predicated region fallthrough
CT: control target
= control target key end

     0   :  { %14 = vsyncpa [#allocation3], 0  ;;  %s4145_s0 = inlined_call_operand.vmem [shape: f32[16,8], index: 0, kind: input, shape index: {}]   ;;  %s4146_s1 = inlined_call_operand.vmem [shape: f32[11,128], index: 1, kind: input, shape index: {}]   ;;  %s4147_s2 = inlined_call_operand.vmem [shape: f32[8,128], index: 2, kind: input, shape index: {}]   ;;  %s4148_s3 = inlined_call_operand.vmem [shape: f32[128,32], index: 3, kind: input, shape index: {}]   ;;  %s4149_s4 = inlined_call_operand.vmem [shape: f32[8,32], index: 4, kind: input, shape index: {}]   ;;  %s4150_s5 = inlined_call_operand.vmem [shape: f32[11,384], index: 5, kind: input, shape index: {}]   ;;  %s4151_s6 = inlined_call_operand.vmem [shape: f32[32,384], index: 6, kind: input, shape index: {}]   ;;  %s4152_s7 = inlined_call_operand.vmem [shape: f32[384,8], index: 7, kind: input, shape index: {}]   ;;  %s4153_s8 = inlined_call_operand.vmem [shape: f32[32,8], index: 8, kind: input, shape index: {}]   ;;  %s4154_s9 = inlined_call_operand.hbm [shape: f32[16,128], index: 9, kind: output, shape index: {}]  }
   0x1   :  { %16 = vsyncpa [#allocation3 + $0x1], 0  ;;  %s3360_s30 = smov 0   ;;  %s3362_s10 = smov 0  }
   0x2   :  { %s3364_s11 = smov 0   ;;  %s3366_s12 = smov 0  }
   0x3 LB: > { %s3381_s13 = sadd.s32 4294967295, %s3301_s12   ;;  %s2660_s14 = sadd.s32 4294967294, %s3301_s12   ;;  %s3301_s12 = sphi %s3366_s12, %s4169_s12   ;;  %s3297_s11 = sphi %s3364_s11, %s4168_s11   ;;  %s3293_s10 = sphi %s3362_s10, %s4167_s10   ;;  %s3289_s30 = sphi %s3360_s30, %s4166_s30  }
   0x4   : > { %s3385_s15 = sadd.s32 1, %s3301_s12   ;;  %s223_s16 = sadd.s32 1, %s3297_s11 }
   0x5   : > { %s220_s17 = ssub.s32 %s3301_s12, %s3385_s15  ;;  %p233_p0 = scmp.ne.s32.totalorder %s3297_s11, %s3293_s10 }
   0x6   : > { %p221_p1 = scmp.eq.s32.totalorder %s220_s17, 0  ;;  %p234_p2 = scmp.eq.s32.totalorder %s3381_s13, 1 }
   0x7   : > { %p239_p3 = scmp.ne.s32.totalorder %s3293_s10, %s3289_s30  ;;  %p240_p4 = scmp.eq.s32.totalorder %s2660_s14, 1 }
   0x8   : > { %s3396_s18 = scalar_select %p221_p1, %s3297_s11, %s223_s16  }
   0x9   : > { %p3398_p5 = por %p234_p2, %p233_p0  ;;  %p3402_p6 = por %p240_p4, %p239_p3 }
   0xa   : > { %p2663_p7 = scmp.ge.s32.totalorder %s3301_s12, 1  ;;  %p289_p8 = scmp.lt.s32.totalorder %s3301_s12, 3 }
   0xc   : > { %p290_p9 = pnand %p2663_p7, %p289_p8 }
   0xd   : > { %v332_v0 = vld [vmem:[%s4147_s2] sm:$0xff] (!%p290_p9)  ;;  %p324_p10 = scmp.lt.s32.totalorder (!%p290_p9), %s3381_s13, 1  ;;  %v3303_v1 = vmov (!%p290_p9), 0.0   ;;  %vm3304_vm0 = vmmov (!%p290_p9), 0   ;;  %vm357_vm1 = vcmask (!%p290_p9), 64512   ;;  %v4155_v14 = vlaneseq (!%p290_p9)  ;;  %s3305_s14 = smov (!%p290_p9), 120  }
   0xe   : > { %293 = sbr.rel (%p290_p9) target bundleno = 1850 (0x73a), region = 56  ;;  %2796 = vmatprep.subr.mxu0 (!%p290_p9), %v3303_v1  ;;  %v362_v2 = vand.u32 (!%p290_p9), 4294901760, %v332_v0  ;;  %2798 = vmatprep.mubr.msk.f32.mxu0 (!%p290_p9), %vm3304_vm0, %v3303_v1  ;;  %v330_v19 = vld [vmem:[%s4146_s1] sm:$0xff] (!%p290_p9)  ;;  %v334_v45 = vld [vmem:[%s4148_s3 + $0x8] sm:$0xff] (!%p290_p9)  ;;  %v335_v46 = vld [vmem:[%s4148_s3 + $0x10] sm:$0xff] (!%p290_p9)  ;;  %v3306_v47 = vmov (!%p290_p9), 0.0|0.0  }
   0xf   : > { %2858 = vmatprep.mubr.msk.f32.mxu1 (!%p290_p9), %vm3304_vm0, %v3303_v1  ;;  %v808_v15 = vshrl.u32 (!%p290_p9), %v4155_v14, 7  ;;  %v333_v44 = vld [vmem:[%s4148_s3] sm:$0xff] (!%p290_p9)  ;;  %2978 = vmatprep.subr.bf16.mxu1 (!%p290_p9), %v3306_v47  ;;  %v336_v49 = vld [vmem:[%s4148_s3 + $0x18] sm:$0xff] (!%p290_p9)  ;;  %v338_v53 = vld [vmem:[%s4148_s3 + $0x28] sm:$0xff] (!%p290_p9)  ;;  %s4157_s29 = sand.u32 (!%p290_p9), 1, %s3293_s10   ;;  %vm1024_vm5 = vcmask (!%p290_p9), 261120  }
  0x10   : > { %2797 = vmatpush3.msra.mxu0 (!%p290_p9), %v362_v2  ;;  %v439_v3 = vsub.f32 (!%p290_p9), %v332_v0, %v362_v2  ;;  %v2979_v48 = vpack.c.bf16 (!%p290_p9), %v334_v45, %v333_v44  ;;  %v2982_v50 = vpack.c.bf16 (!%p290_p9), %v336_v49, %v335_v46  ;;  %v337_v52 = vld [vmem:[%s4148_s3 + $0x20] sm:$0xff] (!%p290_p9)  ;;  %v339_v57 = vld [vmem:[%s4148_s3 + $0x30] sm:$0xff] (!%p290_p9)  ;;  %v340_v58 = vld [vmem:[%s4148_s3 + $0x38] sm:$0xff] (!%p290_p9)  ;;  %s4158_s17 = smov (!%p290_p9), 96   ;;  %s2675_s28 = sshll.u32 (!%p290_p9), %s3381_s13, 7 }
  0x11   : > { %2801 = vmatprep.subr.mxu0 (!%p290_p9), %v3303_v1  ;;  %v3444_v16 = vsub.s32 (!%p290_p9), 0, %v808_v15  ;;  %v3446_v17 = vsub.s32 (!%p290_p9), 1, %v808_v15  ;;  %v3448_v18 = vsub.s32 (!%p290_p9), 2, %v808_v15  ;;  %v3453_v20 = vsub.s32 (!%p290_p9), 5, %v808_v15  ;;  %v341_v61 = vld [vmem:[%s4148_s3 + $0x40] sm:$0xff] (!%p290_p9)  ;;  %v342_v62 = vld [vmem:[%s4148_s3 + $0x48] sm:$0xff] (!%p290_p9)  ;;  %s4100_s22 = scalar_lea.hbm (!%p290_p9), %s4154_s9, %s2675_s28 }
  0x12   : > { %v440_v6 = vand.u32 (!%p290_p9), 4294901760, %v439_v3  ;;  %v3455_v21 = vsub.s32 (!%p290_p9), 3, %v808_v15  ;;  %v3457_v22 = vsub.s32 (!%p290_p9), 4, %v808_v15  ;;  %v3459_v23 = vsub.s32 (!%p290_p9), 6, %v808_v15  ;;  %2980 = vmatpush3.bf16.msra.mxu1 (!%p290_p9), %v2979_v48  ;;  %v343_v0 = vld [vmem:[%s4148_s3 + $0x50] sm:$0xff] (!%p290_p9)  ;;  %s4165_s25 = sand.u32 (!%p290_p9), 1, %s3293_s10  }
  0x13   : > { %v3461_v24 = vsub.s32 (!%p290_p9), 7, %v808_v15  ;;  %v810_v25 = vrot.slane (!%p290_p9), %v330_v19, %v3444_v16  ;;  %v815_v26 = vrot.slane (!%p290_p9), %v330_v19, %v3446_v17  ;;  %v832_v27 = vrot.slane (!%p290_p9), %v330_v19, %v3448_v18  ;;  %2981 = vmatprep.subr.bf16.mxu1 (!%p290_p9), %v3306_v47 }
  0x14   : > { %v441_v9 = vsub.f32 (!%p290_p9), %v439_v3, %v440_v6  ;;  %v852_v28 = vrot.slane (!%p290_p9), %v330_v19, %v3453_v20  ;;  %v826_v29 = vrot.slane (!%p290_p9), %v330_v19, %v3455_v21  ;;  %v837_v30 = vrot.slane (!%p290_p9), %v330_v19, %v3457_v22 }
  0x15   : > { %s325_s23 = scalar_select %p324_p10, %s3381_s13, 1  ;;  %v846_v31 = vrot.slane %v330_v19, %v3459_v23  ;;  %v857_v33 = vrot.slane %v330_v19, %v3461_v24  ;;  %v2985_v56 = vpack.c.bf16 %v338_v53, %v337_v52  ;;  %v2988_v60 = vpack.c.bf16 %v340_v58, %v339_v57  ;;  %v349_v19 = vld [vmem:[%s4149_s4] sm:$0xff] }
  0x16   : > { %v442_v12 = vand.u32 4294901760, %v441_v9  ;;  %2983 = vmatpush3.bf16.msra.mxu1 %v2982_v50  ;;  %v2991_v63 = vpack.c.bf16 %v342_v62, %v341_v61  ;;  %s3309_s13 = smov [#allocation2]  }
  0x17   : > { %s2665_s24 = sshll.u32 %s325_s23, 3  ;;  %2984 = vmatprep.subr.bf16.mxu1 %v3306_v47  ;;  %s2664_s23 = sshll.u32 %s4157_s29, 3 }
  0x18   : > { %s327_s27 = scalar_lea.vmem %s4145_s0, %s2665_s24  ;;  %s3678_s24 = scalar_lea.vmem [#allocation2], %s2664_s23 }
  0x19   : > { %v3422_v4 = vld [vmem:[%s327_s27] sm:$0xff]  ;;  %328 = vst [vmem:[%s3678_s24] sm:$0xff] %v3303_v1  ;;  %s4164_s23 = smov 96   ;;  %s2601_s16 = sshll.u32 %s3678_s24, 4  ;;  %s4102_s16 = int_to_ptr.vmem [resolvable:$true] %s2601_s16 }
  0x1a   : > { %v359_v5 = vsel %vm357_vm1, %v3422_v4, 0  ;;  %2986 = vmatpush3.bf16.msra.mxu1 %v2985_v56  ;;  %s3239_s26 = scalar_lea.vmem %s4102_s16, 128  ;;  %s3243_s27 = sshll.u32 %s3309_s13, 4  ;;  %s3244_s27 = int_to_ptr.vmem [resolvable:$false] %s3243_s27 }
  0x1b   : > { %v427_v7 = vand.u32 4294901760, %v359_v5  ;;  %2987 = vmatprep.subr.bf16.mxu1 %v3306_v47  ;;  %p3240_p11 = scmp.ne.s32.totalorder %s4102_s16, %s3239_s26  ;;  %s3245_s29 = scalar_lea.vmem %s3244_s27, 256 }
  0x1c   : > { %p3246_p0 = scmp.lt.s32.totalorder %s4102_s16, %s3244_s27  ;;  %p3247_p1 = scmp.lt.s32.totalorder %s3245_s29, %s3239_s26 }
  0x1d   : > { %v428_v8 = vsub.f32 %v359_v5, %v427_v7  ;;  %v345_v5 = vld [vmem:[%s4148_s3 + $0x60] sm:$0xff]  ;;  %p3241_p12 = pnand %p3240_p11, %p3398_p5 }
  0x1e   : > { %2989 = vmatpush3.bf16.msra.mxu1 %v2988_v60  ;;  %p3248_p2 = por %p3247_p1, %p3246_p0 }
  0x1f   : > { %v429_v10 = vand.u32 4294901760, %v428_v8  ;;  %2990 = vmatprep.subr.bf16.mxu1 %v3306_v47  ;;  %p3242_p13 = pneg %p3241_p12 }
  0x21   : > { %v430_v11 = vsub.f32 %v428_v8, %v429_v10  ;;  %p3249_p3 = pnand %p3248_p2, %p3242_p13 }
  0x22   : > { %2992 = vmatpush3.bf16.msra.mxu1 %v2991_v63 }
  0x23   : > { %v431_v13 = vand.u32 4294901760, %v430_v11  ;;  %2993 = vmatprep.subr.bf16.mxu1 %v3306_v47 }
  0x25   : > { %2799 = vmatmul.mubr.f32.vlgmr.msra.gmra.mrb[0].mxu0 %v431_v13  ;;  %v348_v13 = vld [vmem:[%s4148_s3 + $0x78] sm:$0xff] }
  0x26   : > { %2802 = vmatpush3.msra.mxu0 %v442_v12  ;;  %2803 = vmatprep.mubr.msk.f32.mxu0 %vm3304_vm0, %v3303_v1  ;;  %v347_v12 = vld [vmem:[%s4148_s3 + $0x70] sm:$0xff] }
  0x27   : > { %2806 = vmatprep.subr.mxu0 %v3303_v1  ;;  %v3000_v15 = vpack.c.bf16 %v348_v13, %v347_v12 }
  0x2d   : > { %2804 = vmatmul.mubr.f32.vlgmr.msra.gmra.mrb[0].mxu0 %v427_v7 }
  0x2e   : > { %2807 = vmatpush3.msra.mxu0 %v439_v3  ;;  %2808 = vmatprep.mubr.msk.f32.mxu0 %vm3304_vm0, %v3303_v1 }
  0x2f   : > { %2811 = vmatprep.subr.mxu0 %v3303_v1 }
  0x35   : > { %2809 = vmatmul.mubr.f32.vlgmr.msra.gmra.mrb[0].mxu0 %v428_v8  ;;  %v2666_v8 = vmul.f32 -1.442695, %v3422_v4 }
  0x36   : > { %2812 = vmatpush3.msra.mxu0 %v362_v2  ;;  %2813 = vmatprep.mubr.msk.f32.mxu0 %vm3304_vm0, %v3303_v1 }
  0x37   : > { %2816 = vmatprep.subr.mxu0 %v3303_v1  ;;  %3231 = vpow2.f32 %v2666_v8 }
  0x3d   : > { %2814 = vmatmul.mubr.f32.vlgmr.msra.gmra.mrb[0].mxu0 %v429_v10 }
  0x3e   : > { %2817 = vmatpush3.msra.mxu0 %v440_v6  ;;  %2818 = vmatprep.mubr.msk.f32.mxu0 %vm3304_vm0, %v3303_v1  ;;  %v346_v6 = vld [vmem:[%s4148_s3 + $0x68] sm:$0xff] }
  0x3f   : > { %2821 = vmatprep.subr.mxu0 %v3303_v1 }
  0x41   : > { %v3232_v9 = vpop.eup %3231 }
  0x42   : > { %v353_v10 = vadd.f32 1.0, %v3232_v9 }
  0x44   : > { %3233 = vrcp.f32 %v353_v10  ;;  %v1032_v10 = vld [vmem:[%s4151_s6] sm:$0xff] }
  0x45   : > { %2819 = vmatmul.mubr.f32.vlgmr.msra.gmra.mrb[0].mxu0 %v427_v7  ;;  %v1108_v12 = vand.u32 4294901760, %v1032_v10 }
  0x46   : > { %2822 = vmatpush3.msra.mxu0 %v362_v2  ;;  %2823 = vmatprep.mubr.msk.f32.mxu0 %vm3304_vm0, %v3303_v1  ;;  %v344_v2 = vld [vmem:[%s4148_s3 + $0x58] sm:$0xff] }
  0x47   : > { %2861 = vmatprep.subr.mxu0 %v3303_v1  ;;  %v2994_v3 = vpack.c.bf16 %v344_v2, %v343_v0 }
  0x49   : > { %2995 = vmatpush3.bf16.msra.mxu1 %v2994_v3 }
  0x4a   : > { %2996 = vmatprep.subr.bf16.mxu1 %v3306_v47 }
  0x4d   : > { %2824 = vmatmul.mubr.f32.vlgmr.msra.gmra.mrb[0].mxu0 %v427_v7  ;;  %v2997_v7 = vpack.c.bf16 %v346_v6, %v345_v5  ;;  %v1033_v5 = vld [vmem:[%s4151_s6 + $0x8] sm:$0xff]  ;;  %v1036_v6 = vld [vmem:[%s4151_s6 + $0x20] sm:$0xff] }
  0x4e   : > { %2863 = vmatprep.mubr.msk.f32.mxu0 %vm3304_vm0, %v3303_v1  ;;  %v3234_v11 = vpop.eup %3233  ;;  %2862 = vmatpush3.msra.mxu0 %v349_v19  ;;  %v1106_v8 = vand.u32 4294901760, %v1033_v5  ;;  %v1110_v9 = vand.u32 4294901760, %v1036_v6 }
  0x4f   : > { %2998 = vmatpush3.bf16.msra.mxu1 %v2997_v7 }
  0x50   : > { %2999 = vmatprep.subr.bf16.mxu1 %v3306_v47  ;;  %v3640_v19 = vsub.f32 %v1033_v5, %v1106_v8 }
  0x53   : > { %3001 = vmatpush3.bf16.msra.mxu1 %v3000_v15  ;;  %v3638_v15 = vpack.c.bf16 %v1110_v9, %v1106_v8 }
  0x54   : > { %3056 = vmatprep.subr.bf16.mxu1 %v3306_v47 }
  0x55   : > { %3003 = vmatprep.subr.bf16.mxu0 %v3638_v15 }
 0x120   : > { %v3470_v32 = vpop.f32.mrb[0].mxu0 }
 0x121   : > { %v2825_v34 = vpop.f32.mrb[1].mxu0  ;;  %vm811_vm2 = vcmp.ge.f32.partialorder %v3470_v32, %v810_v25  ;;  %vm816_vm3 = vcmp.lt.f32.partialorder %v3470_v32, %v815_v26  ;;  %v3476_v35 = vsub.f32 %v3470_v32, %v810_v25  ;;  %v833_v36 = vsub.f32 %v832_v27, %v3470_v32  ;;  %v331_v26 = vld [vmem:[%s4146_s1 + $0x8] sm:$0x7] }
 0x122   : > { %vm817_vm4 = vmand %vm811_vm2, %vm816_vm3  ;;  %v853_v37 = vsub.f32 %v852_v28, %v3470_v32  ;;  %v356_v25 = vmul.f32 %v3234_v11, %v3422_v4  ;;  %v866_v27 = vrot.slane %v331_v26, %v3446_v17  ;;  %v3566_v34 = vld [vmem:[%s4151_s6 + $0x28] sm:$0xff]  ;;  %v877_v45 = vrot.slane %v331_v26, %v3448_v18  ;;  %v1035_v11 = vld [vmem:[%s4151_s6 + $0x18] sm:$0xff] }
 0x123   : > { %v2667_v38 = vsel %vm817_vm4, 1.0, %v3303_v1  ;;  %v827_v39 = vmul.f32 %v826_v29, %v3476_v35  ;;  %v838_v40 = vmul.f32 %v837_v30, %v833_v36  ;;  %v847_v41 = vmul.f32 %v846_v31, %v3476_v35 }
 0x124   : > { %821 = vrot.lane.b32.xlu0 %v2667_v38, %s3305_s14  ;;  %v3484_v42 = vmul.f32 %v857_v33, %v853_v37  ;;  %2864 = vmatmul.mubr.msk.f32.vlgmr.msra.gmra.mrb[2].mxu0 %vm357_vm1, %v356_v25  ;;  %v867_v31 = vmul.f32 %v866_v27, %v3476_v35  ;;  %v3561_v33 = vld [vmem:[%s4151_s6 + $0x10] sm:$0xff]  ;;  %v1653_v37 = vand.u32 4294901760, %v3566_v34  ;;  %v1112_v13 = vand.u32 4294901760, %v1035_v11 }
 0x125   : > { %v828_v43 = vmul.f32 %v2667_v38, %v827_v39  ;;  %1178 = vmatprep.mubr.f32.mxu0 %v3303_v1  ;;  %v1650_v36 = vand.u32 4294901760, %v3561_v33  ;;  %v3642_v25 = vsub.f32 %v1036_v6, %v1110_v9  ;;  %v3646_v27 = vsub.f32 %v1032_v10, %v1108_v12 }
 0x126   : > { %v3578_v38 = vsub.f32 %v3566_v34, %v1653_v37 }
 0x127   : > { %v3573_v35 = vsub.f32 %v3561_v33, %v1650_v36 }
 0x128   : > { %v4162_v33 = vand.u32 4294901760, %v3578_v38 }
 0x129   : > { %v1731_v39 = vand.u32 4294901760, %v3573_v35 }
 0x12b   : > { %v3075_v34 = vpack.c.bf16 %v4162_v33, %v1731_v39 }
 0x196   : > { %v822_v51 = vpop.permute.xlu0 %821 }
 0x197   : > { %v839_v54 = vmul.f32 %v838_v40, %v822_v51  ;;  %v4156_v40 = vand.u32 4294901760, %v3578_v38 }
 0x199   : > { %v840_v55 = vadd.f32 %v839_v54, %v828_v43  ;;  %v1739_v43 = vsub.f32 %v3578_v38, %v4156_v40  ;;  %v3602_v54 = vld [vmem:[%s4151_s6 + $0x58] sm:$0xff] }
 0x19a   : > { %v1659_v56 = vand.u32 4294901760, %v3602_v54 }
 0x19b   : > { %841 = vrot.lane.b32.xlu0 %v840_v55, %s3305_s14  ;;  %v848_v59 = vmul.f32 %v847_v41, %v840_v55  ;;  %v872_v41 = vrot.slane %v331_v26, %v3444_v16  ;;  %v1740_v48 = vand.u32 4294901760, %v1739_v43  ;;  %v3644_v26 = vpack.c.bf16 %v1112_v13, %v1108_v12 }
 0x19c   : > { %v3614_v58 = vsub.f32 %v3602_v54, %v1659_v56  ;;  %v1192_v43 = vand.u32 4294901760, %v3640_v19 }
 0x19d   : > { %v873_v44 = vsub.f32 %v872_v41, %v3470_v32  ;;  %v3597_v32 = vld [vmem:[%s4151_s6 + $0x40] sm:$0xff]  ;;  %v1038_v41 = vld [vmem:[%s4151_s6 + $0x30] sm:$0xff]  ;;  %3005 = vmatpush1.bf16.msra.mxu0 %v3644_v26 }
 0x19e   : > { %v1656_v55 = vand.u32 4294901760, %v3597_v32  ;;  %v1752_v60 = vand.u32 4294901760, %v3614_v58 }
 0x19f   : > { %v878_v49 = vmul.f32 %v877_v45, %v873_v44  ;;  %v1116_v44 = vand.u32 4294901760, %v1038_v41 }
 0x1a0   : > { %v3609_v57 = vsub.f32 %v3597_v32, %v1656_v55  ;;  %v1753_v62 = vsub.f32 %v3614_v58, %v1752_v60 }
 0x1a2   : > { %v1754_v2 = vand.u32 4294901760, %v1753_v62 }
 0x1f7   : > { %v3624_v63 = vpop.f32.mrb[2].mxu0 }
 0x1f8   : > { %v2865_v3 = vpop.f32.mrb[3].mxu0 }
 0x20d   : > { %v842_v28 = vpop.permute.xlu0 %841 }
 0x20e   : > { %v859_v29 = vmul.f32 %v3484_v42, %v842_v28  ;;  %v1732_v42 = vsub.f32 %v3573_v35, %v1731_v39  ;;  %v3648_v28 = vsub.f32 %v1035_v11, %v1112_v13 }
 0x210   : > { %v860_v30 = vadd.f32 %v859_v29, %v848_v59  ;;  %v1733_v46 = vand.u32 4294901760, %v1732_v42  ;;  %v1745_v59 = vand.u32 4294901760, %v3609_v57  ;;  %v1039_v29 = vld [vmem:[%s4151_s6 + $0x38] sm:$0xff]  ;;  %v1041_v42 = vld [vmem:[%s4151_s6 + $0x48] sm:$0xff]  ;;  %v1210_v6 = vand.u32 4294901760, %v3648_v28 }
 0x211   : > { %v1120_v45 = vand.u32 4294901760, %v1041_v42 }
 0x212   : > { %861 = vrot.lane.b32.xlu1 %v860_v30, %s3305_s14  ;;  %v868_v4 = vmul.f32 %v867_v31, %v860_v30  ;;  %v3057_v52 = vpack.c.bf16 %v1740_v48, %v1733_v46  ;;  %v1746_v61 = vsub.f32 %v3609_v57, %v1745_v59  ;;  %v1042_v30 = vld [vmem:[%s4151_s6 + $0x50] sm:$0xff]  ;;  %v1114_v31 = vand.u32 4294901760, %v1039_v29  ;;  %s2588_s14 = scalar_lea.sflag [#allocation3], %s4165_s25 }
 0x213   : > { %v1204_v46 = vand.u32 4294901760, %v3642_v25  ;;  %v1198_v48 = vand.u32 4294901760, %v3646_v27  ;;  %v3686_v62 = vsub.f32 %v1041_v42, %v1120_v45  ;;  %v1211_v12 = vsub.f32 %v3648_v28, %v1210_v6 }
 0x214   : > { %v1747_v0 = vand.u32 4294901760, %v1746_v61  ;;  %v3684_v61 = vsub.f32 %v1038_v41, %v1116_v44  ;;  %v3078_v32 = vpack.c.bf16 %v1752_v60, %v1745_v59 }
 0x215   : > { %v1199_v5 = vsub.f32 %v3646_v27, %v1198_v48  ;;  %v1234_v13 = vand.u32 4294901760, %v3686_v62  ;;  %v1212_v41 = vand.u32 4294901760, %v1211_v12  ;;  %v3020_v12 = vpack.c.bf16 %v3648_v28, %v3646_v27 }
 0x216   : > { %v3060_v7 = vpack.c.bf16 %v1754_v2, %v1747_v0  ;;  %v1205_v0 = vsub.f32 %v3642_v25, %v1204_v46  ;;  %v3066_v2 = vpack.c.bf16 %v3614_v58, %v3609_v57  ;;  %v1222_v10 = vand.u32 4294901760, %v3684_v61 }
 0x217   : > { %v1200_v11 = vand.u32 4294901760, %v1199_v5  ;;  %v1235_v42 = vsub.f32 %v3686_v62, %v1234_v13  ;;  %v3034_v54 = vpack.c.bf16 %v1204_v46, %v1192_v43  ;;  %v3063_v57 = vpack.c.bf16 %v3578_v38, %v3573_v35  ;;  %v1027_v35 = vld [vmem:[%s4150_s5 + $0x8] sm:$0xff] }
 0x219   : > { %v1236_v5 = vand.u32 4294901760, %v1235_v42 }
 0x284   : > { %v862_v50 = vpop.permute.xlu1 %861 }
 0x285   : > { %v879_v51 = vmul.f32 %v878_v49, %v862_v50  ;;  %v3673_v50 = vsub.f32 %v1039_v29, %v1114_v31 }
 0x287   : > { %v880_v53 = vadd.f32 %v879_v51, %v868_v4  ;;  %v1118_v4 = vand.u32 4294901760, %v1042_v30  ;;  %v1216_v8 = vand.u32 4294901760, %v3673_v50 }
 0x289   : > { %2859 = vmatmul.mubr.f32.vlgmr.msra.gmra.mrb[0].mxu1 %v880_v53  ;;  %v3671_v49 = vpack.c.bf16 %v1118_v4, %v1114_v31  ;;  %v3675_v51 = vsub.f32 %v1042_v30, %v1118_v4  ;;  %v3682_v53 = vpack.c.bf16 %v1120_v45, %v1116_v44  ;;  %v1217_v30 = vsub.f32 %v3673_v50, %v1216_v8 }
 0x28a   : > { %3058 = vmatpush3.bf16.msra.mxu1 %v3057_v52  ;;  %2885 = vmatprep.mubr.msk.f32.mxu1 %vm3304_vm0, %v3303_v1  ;;  %v1193_v52 = vsub.f32 %v3640_v19, %v1192_v43  ;;  %v1223_v4 = vsub.f32 %v3684_v61, %v1222_v10  ;;  %v3051_v43 = vpack.c.bf16 %v1653_v37, %v1650_v36  ;;  %v1026_v37 = vld [vmem:[%s4150_s5] sm:$0xff] }
 0x28b   : > { %3059 = vmatprep.subr.bf16.mxu1 %v3306_v47  ;;  %3007 = vmatprep.subr.bf16.mxu0 %v3671_v49  ;;  %v1228_v9 = vand.u32 4294901760, %v3675_v51  ;;  %v1218_v44 = vand.u32 4294901760, %v1217_v30  ;;  %v3722_v30 = vpack.c.bf16 %v1234_v13, %v1222_v10  ;;  %v2137_v38 = vrot.slane %v1026_v37, %v3444_v16 }
 0x28c   : > { %v1194_v3 = vand.u32 4294901760, %v1193_v52  ;;  %3009 = vmatpush1.bf16.msra.mxu0 %v3682_v53  ;;  %v1224_v52 = vand.u32 4294901760, %v1223_v4  ;;  %v2152_v39 = vrot.slane %v1026_v37, %v3446_v17  ;;  %v2258_v10 = vrot.slane %v1027_v35, %v3459_v23 }
 0x28d   : > { %v1229_v31 = vsub.f32 %v3675_v51, %v1228_v9 }
 0x28e   : > { %3061 = vmatpush3.bf16.msra.mxu1 %v3060_v7  ;;  %v1206_v7 = vand.u32 4294901760, %v1205_v0  ;;  %v3012_v0 = vpack.c.bf16 %v1212_v41, %v1200_v11  ;;  %v3016_v40 = vpack.c.bf16 %v1236_v5, %v1224_v52  ;;  %v3024_v11 = vpack.c.bf16 %v3686_v62, %v3684_v61 }
 0x28f   : > { %3062 = vmatprep.subr.bf16.mxu1 %v3306_v47  ;;  %v1230_v45 = vand.u32 4294901760, %v1229_v31  ;;  %v2195_v61 = vrot.slane %v1027_v35, %v3455_v21  ;;  %v2276_v62 = vrot.slane %v1027_v35, %v3453_v20 }
 0x290   : > { %v3010_v29 = vpack.c.bf16 %v1206_v7, %v1194_v3  ;;  %v3708_v3 = vpack.c.bf16 %v1659_v56, %v1656_v55  ;;  %v3018_v7 = vpack.c.bf16 %v3642_v25, %v3640_v19  ;;  %v3036_v55 = vpack.c.bf16 %v1210_v6, %v1198_v48 }
 0x291   : > { %v3014_v14 = vpack.c.bf16 %v1230_v45, %v1218_v44  ;;  %v3038_v56 = vpack.c.bf16 %v1228_v9, %v1216_v8  ;;  %v2156_v48 = vrot.slane %v1027_v35, %v3446_v17  ;;  %v2287_v6 = vrot.slane %v1026_v37, %v3461_v24 }
 0x292   : > { %3011 = vmatprep.subr.bf16.mxu0 %v3010_v29  ;;  %v3022_v29 = vpack.c.bf16 %v3675_v51, %v3673_v50  ;;  %v2191_v50 = vrot.slane %v1026_v37, %v3455_v21  ;;  %v2228_v51 = vrot.slane %v1027_v35, %v3457_v22  ;;  %v2291_v8 = vrot.slane %v1027_v35, %v3461_v24 }
 0x293   : > { %v2254_v9 = vrot.slane %v1026_v37, %v3459_v23 }
 0x35c   : > { %v947_v19 = vpop.f32.mrb[0].mxu1 }
 0x35d   : > { %v3725_v25 = vadd.f32 %v3624_v63, %v947_v19  ;;  %v2860_v27 = vpop.f32.mrb[1].mxu1 }
 0x35f   : > { %v1104_v28 = vsel %vm1024_vm5, %v3725_v25, 0  ;;  %1025 = vst.msk [vmem:[%s3678_s24] sm:$0xff] %vm1024_vm5, %v3725_v25 }
 0x360   : > { %v1179_v58 = vand.u32 4294901760, %v1104_v28 }
 0x362   : > { %v1180_v59 = vsub.f32 %v1104_v28, %v1179_v58  ;;  %2886 = vmatmul.mubr.f32.vlgmr.msra.gmra.mrb[2].mxu1 %v1179_v58 }
 0x363   : > { %3064 = vmatpush3.bf16.msra.mxu1 %v3063_v57  ;;  %2896 = vmatprep.mubr.msk.f32.mxu1 %vm3304_vm0, %v3303_v1 }
 0x364   : > { %3065 = vmatprep.subr.bf16.mxu1 %v3306_v47  ;;  %v1181_v60 = vand.u32 4294901760, %v1180_v59 }
 0x366   : > { %v1182_v63 = vsub.f32 %v1180_v59, %v1181_v60 }
 0x367   : > { %3067 = vmatpush3.bf16.msra.mxu1 %v3066_v2 }
 0x368   : > { %v1183_v46 = vand.u32 4294901760, %v1182_v63  ;;  %3068 = vmatprep.subr.bf16.mxu1 %v3306_v47 }
 0x36a   : > { %1184 = vmatmul.mubr.f32.vlgmr.msra.gmra.mrb[4].mxu0 %v1183_v46  ;;  %2897 = vmatmul.mubr.f32.vlgmr.msra.gmra.mrb[2].mxu1 %v1180_v59 }
 0x36b   : > { %3013 = vmatpush1.bf16.msra.mxu0 %v3012_v0  ;;  %3070 = vmatpush3.bf16.msra.mxu1 %v3051_v43 }
 0x36c   : > { %3015 = vmatprep.subr.bf16.mxu0 %v3014_v14  ;;  %3071 = vmatprep.subr.bf16.mxu1 %v3306_v47 }
 0x36d   : > { %1294 = vmatprep.mubr.f32.mxu0 %v3303_v1  ;;  %2907 = vmatprep.mubr.msk.f32.mxu1 %vm3304_vm0, %v3303_v1 }
 0x36f   : > { %3017 = vmatpush1.bf16.msra.mxu0 %v3016_v40  ;;  %3073 = vmatpush3.bf16.msra.mxu1 %v3708_v3  ;;  %v2209_v40 = vrot.slane %v1026_v37, %v3448_v18 }
 0x370   : > { %3019 = vmatprep.subr.bf16.mxu0 %v3018_v7  ;;  %3074 = vmatprep.subr.bf16.mxu1 %v3306_v47 }
 0x372   : > { %1296 = vmatmul.mubr.f32.vlgmr.msra.gmra.mrb[4].mxu0 %v1179_v58  ;;  %2908 = vmatmul.mubr.f32.vlgmr.msra.gmra.mrb[2].mxu1 %v1181_v60 }
 0x373   : > { %3021 = vmatpush1.bf16.msra.mxu0 %v3020_v12  ;;  %3076 = vmatpush3.bf16.msra.mxu1 %v3075_v34 }
 0x374   : > { %3023 = vmatprep.subr.bf16.mxu0 %v3022_v29  ;;  %3077 = vmatprep.subr.bf16.mxu1 %v3306_v47 }
 0x375   : > { %1382 = vmatprep.mubr.f32.mxu0 %v3303_v1  ;;  %2918 = vmatprep.mubr.msk.f32.mxu1 %vm3304_vm0, %v3303_v1 }
 0x377   : > { %3025 = vmatpush1.bf16.msra.mxu0 %v3024_v11  ;;  %3079 = vmatpush3.bf16.msra.mxu1 %v3078_v32 }
 0x378   : > { %3027 = vmatprep.subr.bf16.mxu0 %v3638_v15  ;;  %3080 = vmatprep.subr.bf16.mxu1 %v3306_v47 }
 0x37a   : > { %1385 = vmatmul.mubr.f32.vlgmr.msra.gmra.mrb[4].mxu0 %v1180_v59  ;;  %2919 = vmatmul.mubr.f32.vlgmr.msra.gmra.mrb[2].mxu1 %v1179_v58 }
 0x37b   : > { %3029 = vmatpush1.bf16.msra.mxu0 %v3644_v26  ;;  %3082 = vmatpush3.bf16.msra.mxu1 %v3051_v43 }
 0x37c   : > { %3031 = vmatprep.subr.bf16.mxu0 %v3671_v49  ;;  %3083 = vmatprep.subr.bf16.mxu1 %v3306_v47 }
 0x37d   : > { %1463 = vmatprep.mubr.f32.mxu0 %v3303_v1  ;;  %2929 = vmatprep.mubr.msk.f32.mxu1 %vm3304_vm0, %v3303_v1 }
 0x37f   : > { %3033 = vmatpush1.bf16.msra.mxu0 %v3682_v53  ;;  %3085 = vmatpush3.bf16.msra.mxu1 %v3708_v3 }
 0x380   : > { %3035 = vmatprep.subr.bf16.mxu0 %v3034_v54  ;;  %3118 = vmatprep.subr.bf16.mxu1 %v3306_v47 }
 0x382   : > { %1467 = vmatmul.mubr.f32.vlgmr.msra.gmra.mrb[4].mxu0 %v1181_v60  ;;  %2930 = vmatmul.mubr.f32.vlgmr.msra.gmra.mrb[2].mxu1 %v1179_v58 }
 0x383   : > { %3037 = vmatpush1.bf16.msra.mxu0 %v3036_v55  ;;  %1561 = vmatprep.mubr.f32.mxu0 %v3303_v1 }
 0x384   : > { %3039 = vmatprep.subr.bf16.mxu0 %v3038_v56  ;;  %2964 = vmatprep.mubr.msk.f32.mxu1 %vm3304_vm0, %v3303_v1 }
 0x387   : > { %3041 = vmatpush1.bf16.msra.mxu0 %v3722_v30 }
 0x388   : > { %3043 = vmatprep.subr.bf16.mxu0 %v3638_v15  ;;  %v2272_v15 = vrot.slane %v1026_v37, %v3453_v20 }
 0x38a   : > { %1563 = vmatmul.mubr.f32.vlgmr.msra.gmra.mrb[4].mxu0 %v1179_v58 }
 0x38b   : > { %3045 = vmatpush1.bf16.msra.mxu0 %v3644_v26  ;;  %1641 = vmatprep.mubr.f32.mxu0 %v3303_v1  ;;  %v2141_v26 = vrot.slane %v1027_v35, %v3444_v16 }
 0x38c   : > { %3047 = vmatprep.subr.bf16.mxu0 %v3671_v49  ;;  %v2213_v49 = vrot.slane %v1027_v35, %v3448_v18 }
 0x38f   : > { %3049 = vmatpush1.bf16.msra.mxu0 %v3682_v53  ;;  %v2224_v53 = vrot.slane %v1026_v37, %v3457_v22 }
 0x390   : > { %3050 = vmatprep.subr.bf16.mxu0 %v3306_v47 }
 0x392   : > { %1643 = vmatmul.mubr.f32.vlgmr.msra.gmra.mrb[4].mxu0 %v1179_v58 }
 0x393   : > { %3052 = vmatpush3.bf16.msra.mxu0 %v3051_v43  ;;  %2874 = vmatprep.mubr.msk.f32.mxu0 %vm3304_vm0, %v3303_v1 }
 0x394   : > { %3053 = vmatprep.subr.bf16.mxu0 %v3306_v47 }
 0x397   : > { %3055 = vmatpush3.bf16.msra.mxu0 %v3708_v3  ;;  %v1028_v3 = vld [vmem:[%s4150_s5 + $0x10] sm:$0xff] }
 0x398   : > { %v2145_v27 = vrot.slane %v1028_v3, %v3444_v16  ;;  %v2160_v28 = vrot.slane %v1028_v3, %v3446_v17  ;;  %v2217_v57 = vrot.slane %v1028_v3, %v3448_v18  ;;  %v2280_v59 = vrot.slane %v1028_v3, %v3453_v20 }
 0x399   : > { %v2199_v43 = vrot.slane %v1028_v3, %v3455_v21  ;;  %v2262_v33 = vrot.slane %v1028_v3, %v3459_v23  ;;  %v2295_v34 = vrot.slane %v1028_v3, %v3461_v24 }
 0x39a   : > { %2875 = vmatmul.mubr.f32.vlgmr.msra.gmra.mrb[6].mxu0 %v1183_v46  ;;  %v2232_v46 = vrot.slane %v1028_v3, %v3457_v22 }
 0x455   : > { %v2130_v14 = vpop.f32.mrb[2].mxu1 }
 0x456   : > { %v2931_v36 = vpop.f32.mrb[3].mxu1 }
 0x465   : > { %v3799_v2 = vpop.f32.mrb[4].mxu0 }
 0x466   : > { %v3805_v13 = vpop.f32.mrb[5].mxu0  ;;  %vm2146_vm6 = vcmp.ge.f32.partialorder %v3799_v2, %v2137_v38  ;;  %vm2161_vm7 = vcmp.lt.f32.partialorder %v3799_v2, %v2152_v39  ;;  %v3810_v31 = vsub.f32 %v3799_v2, %v2137_v38  ;;  %v2218_v4 = vsub.f32 %v2209_v40, %v3799_v2 }
 0x467   : > { %vm2147_vm8 = vcmp.ge.f32.partialorder %v3805_v13, %v2141_v26  ;;  %vm2162_vm9 = vcmp.lt.f32.partialorder %v3805_v13, %v2156_v48  ;;  %vm2164_vm10 = vmand %vm2146_vm6, %vm2161_vm7  ;;  %v3816_v41 = vsub.f32 %v3805_v13, %v2141_v26  ;;  %v2219_v42 = vsub.f32 %v2213_v49, %v3805_v13 }
 0x468   : > { %vm2165_vm11 = vmand %vm2147_vm8, %vm2162_vm9  ;;  %v2670_v44 = vsel %vm2164_vm10, 1.0, %v3303_v1  ;;  %v2200_v45 = vmul.f32 %v2191_v50, %v3810_v31  ;;  %v2233_v52 = vmul.f32 %v2224_v53, %v2218_v4  ;;  %v2281_v0 = vsub.f32 %v2272_v15, %v3799_v2  ;;  %v1078_v4 = vld [vmem:[%s4152_s7 + $0x110] sm:$0xff] }
 0x469   : > { %v2671_v5 = vsel %vm2165_vm11, 1.0, %v3303_v1  ;;  %v2234_v7 = vmul.f32 %v2228_v51, %v2219_v42  ;;  %v2201_v12 = vmul.f32 %v2195_v61, %v3816_v41  ;;  %v2282_v29 = vsub.f32 %v2276_v62, %v3805_v13 }
 0x46a   : > { %v3226_v11 = vpack.i.bf16 %v2671_v5, %v2670_v44  ;;  %v2203_v32 = vmul.f32 %v2670_v44, %v2200_v45  ;;  %v3828_v54 = vmul.f32 %v2287_v6, %v2281_v0  ;;  %v2263_v55 = vmul.f32 %v2254_v9, %v3810_v31  ;;  %v1076_v9 = vld [vmem:[%s4152_s7 + $0x100] sm:$0xff]  ;;  %v1079_v44 = vld [vmem:[%s4152_s7 + $0x118] sm:$0xff] }
 0x46b   : > { %v2204_v56 = vmul.f32 %v2671_v5, %v2201_v12  ;;  %v3831_v30 = vmul.f32 %v2291_v8, %v2282_v29  ;;  %v3834_v19 = vmul.f32 %v2258_v10, %v3816_v41  ;;  %v4163_v38 = vlaneseq  ;;  %v1077_v10 = vld [vmem:[%s4152_s7 + $0x108] sm:$0xff]  ;;  %v1060_v45 = vld [vmem:[%s4152_s7 + $0x80] sm:$0xff] }
 0x46c   : > { %3227 = vrot.lane.b32.xlu1 %v3226_v11, %s4158_s17  ;;  %v3119_v42 = vpack.c.bf16 %v1077_v10, %v1076_v9  ;;  %v1045_v12 = vld [vmem:[%s4152_s7 + $0x8] sm:$0xff]  ;;  %v1080_v29 = vld [vmem:[%s4152_s7 + $0x120] sm:$0xff]  ;;  %v3122_v11 = vpack.c.bf16 %v1079_v44, %v1078_v4  ;;  %v1087_v4 = vld [vmem:[%s4152_s7 + $0x158] sm:$0xff] }
 0x46d   : > { %v1724_v58 = vpop.f32.mrb[6].mxu0  ;;  %v3861_v39 = vand.u32 127, %v4163_v38  ;;  %v1052_v9 = vld [vmem:[%s4152_s7 + $0x40] sm:$0xff]  ;;  %v1053_v10 = vld [vmem:[%s4152_s7 + $0x48] sm:$0xff]  ;;  %v1071_v44 = vld [vmem:[%s4152_s7 + $0xd8] sm:$0xff] }
 0x46e   : > { %v3841_v60 = vadd.f32 %v2130_v14, %v1724_v58  ;;  %v2876_v63 = vpop.f32.mrb[7].mxu0  ;;  %3120 = vmatpush3.bf16.msra.mxu1 %v3119_v42  ;;  %v1046_v58 = vld [vmem:[%s4152_s7 + $0x10] sm:$0xff] }
 0x46f   : > { %vm2184_vm15 = vcmp.lt.s32.totalorder %v3861_v39, 96  ;;  %3121 = vmatprep.subr.bf16.mxu1 %v3306_v47  ;;  %v1070_v42 = vld [vmem:[%s4152_s7 + $0xd0] sm:$0xff] }
 0x470   : > { %vm2148_vm12 = vcmp.ge.f32.partialorder %v3841_v60, %v2145_v27  ;;  %vm2163_vm13 = vcmp.lt.f32.partialorder %v3841_v60, %v2160_v28  ;;  %v3850_v36 = vsub.f32 %v3841_v60, %v2145_v27  ;;  %v2220_v20 = vsub.f32 %v2217_v57, %v3841_v60  ;;  %v1063_v27 = vld [vmem:[%s4152_s7 + $0x98] sm:$0xff] }
 0x471   : > { %vm2166_vm14 = vmand %vm2148_vm12, %vm2163_vm13  ;;  %v2283_v14 = vsub.f32 %v2280_v59, %v3841_v60  ;;  %v1047_v59 = vld [vmem:[%s4152_s7 + $0x18] sm:$0xff] }
 0x472   : > { %v2672_v21 = vsel %vm2166_vm14, 1.0, %v3303_v1  ;;  %v2202_v22 = vmul.f32 %v2199_v43, %v3850_v36  ;;  %v2235_v37 = vmul.f32 %v2232_v46, %v2220_v20  ;;  %v2265_v23 = vmul.f32 %v2262_v33, %v3850_v36  ;;  %v1064_v43 = vld [vmem:[%s4152_s7 + $0xa0] sm:$0xff]  ;;  %3123 = vmatpush3.bf16.msra.mxu1 %v3122_v11 }
 0x473   : > { %2180 = vrot.lane.b32.xlu0 %v2672_v21, %s4158_s17  ;;  %v3858_v24 = vmul.f32 %v2295_v34, %v2283_v14  ;;  %v3092_v46 = vpack.c.bf16 %v1047_v59, %v1046_v58  ;;  %v1082_v34 = vld [vmem:[%s4152_s7 + $0x130] sm:$0xff]  ;;  %v1048_v14 = vld [vmem:[%s4152_s7 + $0x20] sm:$0xff]  ;;  %3124 = vmatprep.subr.bf16.mxu1 %v3306_v47  ;;  %v1073_v59 = vld [vmem:[%s4152_s7 + $0xe8] sm:$0xff] }
 0x474   : > { %v2205_v35 = vmul.f32 %v2672_v21, %v2202_v22  ;;  %v1049_v21 = vld [vmem:[%s4152_s7 + $0x28] sm:$0xff]  ;;  %v1083_v22 = vld [vmem:[%s4152_s7 + $0x138] sm:$0xff] }
 0x475   : > { %v3128_v38 = vpack.c.bf16 %v1083_v22, %v1082_v34  ;;  %v1030_v34 = vld [vmem:[%s4150_s5 + $0x20] sm:$0x7] }
 0x4de   : > { %v3228_v40 = vpop.permute.xlu1 %3227 }
 0x4df   : > { %v3230_v15 = vunpack.i.h.bf16 %v3228_v40  ;;  %v3229_v26 = vunpack.i.l.bf16 %v3228_v40  ;;  %v1084_v40 = vld [vmem:[%s4152_s7 + $0x140] sm:$0xff] }
 0x4e1   : > { %v2186_v48 = vsel %vm2184_vm15, %v3229_v26, %v3230_v15 }
 0x4e2   : > { %v2236_v49 = vmul.f32 %v2233_v52, %v2186_v48  ;;  %v1061_v52 = vld [vmem:[%s4152_s7 + $0x88] sm:$0xff]  ;;  %v1051_v48 = vld [vmem:[%s4152_s7 + $0x38] sm:$0xff] }
 0x4e3   : > { %v3086_v3 = vpack.c.bf16 %v1061_v52, %v1060_v45  ;;  %v3104_v45 = vpack.c.bf16 %v1053_v10, %v1052_v9 }
 0x4e4   : > { %v2239_v50 = vadd.f32 %v2236_v49, %v2203_v32  ;;  %v1085_v49 = vld [vmem:[%s4152_s7 + $0x148] sm:$0xff] }
 0x4e5   : > { %v2181_v51 = vpop.permute.xlu0 %2180  ;;  %3087 = vmatprep.subr.bf16.mxu0 %v3086_v3  ;;  %v1055_v3 = vld [vmem:[%s4152_s7 + $0x58] sm:$0xff] }
 0x4e6   : > { %v2185_v53 = vsel %vm2184_vm15, %v3230_v15, %v2181_v51  ;;  %v2187_v61 = vsel %vm2184_vm15, %v2181_v51, %v3229_v26  ;;  %2242 = vrot.lane.b32.xlu1 %v2239_v50, %s4158_s17  ;;  %v3871_v62 = vmul.f32 %v2263_v55, %v2239_v50  ;;  %v1081_v55 = vld [vmem:[%s4152_s7 + $0x128] sm:$0xff]  ;;  %v1050_v26 = vld [vmem:[%s4152_s7 + $0x30] sm:$0xff]  ;;  %v1068_v50 = vld [vmem:[%s4152_s7 + $0xc0] sm:$0xff]  ;;  %s3308_s17 = smov 32  }
 0x4e7   : > { %v2237_v6 = vmul.f32 %v2234_v7, %v2185_v53  ;;  %v2238_v8 = vmul.f32 %v2235_v37, %v2187_v61  ;;  %v1044_v7 = vld [vmem:[%s4152_s7] sm:$0xff]  ;;  %v3125_v33 = vpack.c.bf16 %v1081_v55, %v1080_v29  ;;  %v1066_v37 = vld [vmem:[%s4152_s7 + $0xb0] sm:$0xff]  ;;  %v1069_v51 = vld [vmem:[%s4152_s7 + $0xc8] sm:$0xff]  ;;  %v3100_v53 = vpack.c.bf16 %v1051_v48, %v1050_v26 }
 0x4e8   : > { %v3088_v32 = vpack.c.bf16 %v1045_v12, %v1044_v7  ;;  %v3131_v61 = vpack.c.bf16 %v1085_v49, %v1084_v40  ;;  %v1088_v7 = vld [vmem:[%s4152_s7 + $0x160] sm:$0xff]  ;;  %v1089_v12 = vld [vmem:[%s4152_s7 + $0x168] sm:$0xff]  ;;  %v1091_v55 = vld [vmem:[%s4152_s7 + $0x178] sm:$0xff] }
 0x4e9   : > { %v2240_v0 = vadd.f32 %v2237_v6, %v2204_v56  ;;  %v2241_v5 = vadd.f32 %v2238_v8, %v2205_v35  ;;  %v1062_v56 = vld [vmem:[%s4152_s7 + $0x90] sm:$0xff]  ;;  %v3096_v35 = vpack.c.bf16 %v1049_v21, %v1048_v14  ;;  %3126 = vmatpush3.bf16.msra.mxu1 %v3125_v33  ;;  %v3102_v8 = vpack.c.bf16 %v1069_v51, %v1068_v50  ;;  %v1029_v33 = vld [vmem:[%s4150_s5 + $0x18] sm:$0x7]  ;;  %v1031_v14 = vld [vmem:[%s4150_s5 + $0x28] sm:$0x7] }
 0x4ea   : > { %v3090_v63 = vpack.c.bf16 %v1063_v27, %v1062_v56  ;;  %3089 = vmatpush3.bf16.msra.mxu0 %v3088_v32  ;;  %3127 = vmatprep.subr.bf16.mxu1 %v3306_v47  ;;  %v1086_v6 = vld [vmem:[%s4152_s7 + $0x150] sm:$0xff]  ;;  %v3137_v11 = vpack.c.bf16 %v1089_v12, %v1088_v7  ;;  %v1072_v56 = vld [vmem:[%s4152_s7 + $0xe0] sm:$0xff]  ;;  %v2321_v21 = vrot.slane %v1030_v34, %v3446_v17  ;;  %v1075_v26 = vld [vmem:[%s4152_s7 + $0xf8] sm:$0xff] }
 0x4eb   : > { %2244 = vrot.lane.b32.xlu0 %v2240_v0, %s4164_s23  ;;  %2246 = vrot.lane.b32.xlu1 %v2241_v5, %s4164_s23  ;;  %v3911_v28 = vmul.f32 %v2265_v23, %v2241_v5  ;;  %v3914_v57 = vmul.f32 %v3834_v19, %v2240_v0  ;;  %v1065_v19 = vld [vmem:[%s4152_s7 + $0xa8] sm:$0xff]  ;;  %v1067_v23 = vld [vmem:[%s4152_s7 + $0xb8] sm:$0xff]  ;;  %v3134_v52 = vpack.c.bf16 %v1087_v4, %v1086_v6 }
 0x4ec   : > { %3091 = vmatprep.subr.bf16.mxu0 %v3090_v63  ;;  %v3094_v20 = vpack.c.bf16 %v1065_v19, %v1064_v43  ;;  %v3098_v15 = vpack.c.bf16 %v1067_v23, %v1066_v37  ;;  %v3106_v0 = vpack.c.bf16 %v1071_v44, %v1070_v42  ;;  %v1054_v5 = vld [vmem:[%s4152_s7 + $0x50] sm:$0xff]  ;;  %v1056_v63 = vld [vmem:[%s4152_s7 + $0x60] sm:$0xff]  ;;  %v1057_v43 = vld [vmem:[%s4152_s7 + $0x68] sm:$0xff]  ;;  %v2325_v23 = vrot.slane %v1031_v14, %v3446_v17 }
 0x4ed   : > { %3129 = vmatpush3.bf16.msra.mxu1 %v3128_v38  ;;  %v3108_v29 = vpack.c.bf16 %v1055_v3, %v1054_v5  ;;  %v1090_v32 = vld [vmem:[%s4152_s7 + $0x170] sm:$0xff]  ;;  %v3112_v19 = vpack.c.bf16 %v1057_v43, %v1056_v63  ;;  %v1059_v48 = vld [vmem:[%s4152_s7 + $0x78] sm:$0xff]  ;;  %v2335_v44 = vrot.slane %v1029_v33, %v3444_v16 }
 0x4ee   : > { %3093 = vmatpush3.bf16.msra.mxu0 %v3092_v46  ;;  %3130 = vmatprep.subr.bf16.mxu1 %v3306_v47  ;;  %v3140_v58 = vpack.c.bf16 %v1091_v55, %v1090_v32  ;;  %v3110_v46 = vpack.c.bf16 %v1073_v59, %v1072_v56  ;;  %v2328_v4 = vmul.f32 %v2325_v23, %v3850_v36 }
 0x4ef   : > { %3095 = vmatprep.subr.bf16.mxu0 %v3094_v20  ;;  %v2317_v20 = vrot.slane %v1029_v33, %v3446_v17  ;;  %v1058_v17 = vld [vmem:[%s4152_s7 + $0x70] sm:$0xff]  ;;  %v2344_v7 = vsub.f32 %v2335_v44, %v3799_v2 }
 0x4f0   : > { %v3116_v6 = vpack.c.bf16 %v1059_v48, %v1058_v17 }
 0x4f1   : > { %3132 = vmatpush3.bf16.msra.mxu1 %v3131_v61  ;;  %v2326_v61 = vmul.f32 %v2317_v20, %v3810_v31 }
 0x4f2   : > { %3097 = vmatpush3.bf16.msra.mxu0 %v3096_v35  ;;  %3133 = vmatprep.subr.bf16.mxu1 %v3306_v47  ;;  %v1074_v35 = vld [vmem:[%s4152_s7 + $0xf0] sm:$0xff] }
 0x4f3   : > { %3099 = vmatprep.subr.bf16.mxu0 %v3098_v15 }
 0x4f5   : > { %3135 = vmatpush3.bf16.msra.mxu1 %v3134_v52  ;;  %v2350_v52 = vrot.slane %v1029_v33, %v3448_v18 }
 0x4f6   : > { %3101 = vmatpush3.bf16.msra.mxu0 %v3100_v53  ;;  %3136 = vmatprep.subr.bf16.mxu1 %v3306_v47  ;;  %v3114_v53 = vpack.c.bf16 %v1075_v26, %v1074_v35 }
 0x4f7   : > { %3103 = vmatprep.subr.bf16.mxu0 %v3102_v8  ;;  %v2327_v8 = vmul.f32 %v2321_v21, %v3816_v41  ;;  %v2669_v41 = vmul.f32 -1.442695, %v3725_v25 }
 0x4f9   : > { %3138 = vmatpush3.bf16.msra.mxu1 %v3137_v11  ;;  %3235 = vpow2.f32 %v2669_v41 }
 0x4fa   : > { %3105 = vmatpush3.bf16.msra.mxu0 %v3104_v45  ;;  %3139 = vmatprep.subr.bf16.mxu1 %v3306_v47  ;;  %v2339_v45 = vrot.slane %v1030_v34, %v3444_v16 }
 0x4fb   : > { %3107 = vmatprep.subr.bf16.mxu0 %v3106_v0 }
 0x4fc   : > { %v2345_v12 = vsub.f32 %v2339_v45, %v3805_v13  ;;  %v1095_v13 = vld [vmem:[%s4153_s8 + $0x18] sm:$0xff] }
 0x4fd   : > { %3141 = vmatpush3.bf16.msra.mxu1 %v3140_v58 }
 0x4fe   : > { %3109 = vmatpush3.bf16.msra.mxu0 %v3108_v29  ;;  %3142 = vmatprep.subr.bf16.mxu1 %v3306_v47  ;;  %v2354_v29 = vrot.slane %v1030_v34, %v3448_v18 }
 0x4ff   : > { %3111 = vmatprep.subr.bf16.mxu0 %v3110_v46 }
 0x500   : > { %v2360_v2 = vmul.f32 %v2354_v29, %v2345_v12 }
 0x502   : > { %3113 = vmatpush3.bf16.msra.mxu0 %v3112_v19 }
 0x503   : > { %3115 = vmatprep.subr.bf16.mxu0 %v3114_v53 }
 0x506   : > { %3117 = vmatpush3.bf16.msra.mxu0 %v3116_v6 }
 0x558   : > { %v2243_v27 = vpop.permute.xlu1 %2242 }
 0x55d   : > { %v2245_v22 = vpop.permute.xlu0 %2244  ;;  %v2247_v37 = vpop.permute.xlu1 %2246 }
 0x55e   : > { %v2249_v38 = vsel %vm2184_vm15, %v2243_v27, %v2245_v22  ;;  %v2248_v40 = vsel %vm2184_vm15, %v2245_v22, %v2247_v37  ;;  %v2250_v15 = vsel %vm2184_vm15, %v2247_v37, %v2243_v27  ;;  %v2359_v27 = vmul.f32 %v2350_v52, %v2344_v7 }
 0x55f   : > { %v2299_v49 = vmul.f32 %v3828_v54, %v2249_v38  ;;  %v2300_v50 = vmul.f32 %v3831_v30, %v2248_v40  ;;  %v2301_v51 = vmul.f32 %v3858_v24, %v2250_v15  ;;  %v3236_v24 = vpop.eup %3235 }
 0x560   : > { %v1099_v36 = vadd.f32 1.0, %v3236_v24 }
 0x561   : > { %v2302_v9 = vadd.f32 %v2299_v49, %v3871_v62  ;;  %v2304_v10 = vadd.f32 %v2301_v51, %v3911_v28  ;;  %v2303_v42 = vadd.f32 %v2300_v50, %v3914_v57  ;;  %v2343_v62 = vrot.slane %v1031_v14, %v3444_v16  ;;  %v1093_v16 = vld [vmem:[%s4153_s8 + $0x8] sm:$0xff] }
 0x562   : > { %v2358_v57 = vrot.slane %v1031_v14, %v3448_v18  ;;  %3237 = vrcp.f32 %v1099_v36  ;;  %v1094_v18 = vld [vmem:[%s4153_s8 + $0x10] sm:$0xff] }
 0x563   : > { %2305 = vrot.lane.b32.xlu0 %v2302_v9, %s4164_s23  ;;  %v2329_v54 = vmul.f32 %v2326_v61, %v2302_v9  ;;  %2309 = vrot.lane.b32.xlu1 %v2304_v10, %s4164_s23  ;;  %v2331_v30 = vmul.f32 %v2328_v4, %v2304_v10  ;;  %v2330_v31 = vmul.f32 %v2327_v8, %v2303_v42 }
 0x564   : > { %v2346_v28 = vsub.f32 %v2343_v62, %v3841_v60  ;;  %v1092_v60 = vld [vmem:[%s4153_s8] sm:$0xff]  ;;  %v3146_v19 = vpack.c.bf16 %v1095_v13, %v1094_v18 }
 0x565   : > { %v3143_v55 = vpack.c.bf16 %v1093_v16, %v1092_v60 }
 0x566   : > { %v2361_v5 = vmul.f32 %v2358_v57, %v2346_v28 }
 0x567   : > { %2307 = vrot.lane.b32.xlu0 %v2303_v42, %s4164_s23 }
 0x56c   : > { %v3238_v20 = vpop.eup %3237 }
 0x56d   : > { %v1102_v39 = vmul.f32 %v3238_v20, %v3725_v25 }
 0x5d5   : > { %v2306_v0 = vpop.permute.xlu0 %2305  ;;  %v2310_v3 = vpop.permute.xlu1 %2309 }
 0x5d6   : > { %v2313_v11 = vsel %vm2184_vm15, %v2310_v3, %v2306_v0 }
 0x5d7   : > { %v2364_v32 = vmul.f32 %v2361_v5, %v2313_v11 }
 0x5d9   : > { %v2367_v56 = vadd.f32 %v2364_v32, %v2331_v30  ;;  %v2308_v58 = vpop.permute.xlu0 %2307 }
 0x5da   : > { %v2311_v59 = vsel %vm2184_vm15, %v2308_v58, %v2310_v3  ;;  %v2312_v63 = vsel %vm2184_vm15, %v2306_v0, %v2308_v58 }
 0x5db   : > { %v2362_v43 = vmul.f32 %v2359_v27, %v2312_v63  ;;  %v2363_v46 = vmul.f32 %v2360_v2, %v2311_v59  ;;  %2965 = vmatmul.mubr.f32.vlgmr.msra.gmra.mrb[4].mxu1 %v2367_v56 }
 0x5dc   : > { %3144 = vmatpush3.bf16.msra.mxu1 %v3143_v55  ;;  %2975 = vmatprep.mubr.msk.f32.mxu1 %vm3304_vm0, %v3303_v1  ;;  %vm2585_vm0 = vcmask 326912  }
 0x5dd   : > { %v2365_v33 = vadd.f32 %v2362_v43, %v2329_v54  ;;  %3145 = vmatprep.subr.bf16.mxu1 %v3306_v47  ;;  %v2366_v34 = vadd.f32 %v2363_v46, %v2330_v31 }
 0x5df   : > { %2432 = vmatprep.mubr.f32.mxu0 %v2366_v34 }
 0x5e0   : > { %3147 = vmatpush3.bf16.msra.mxu1 %v3146_v19  ;;  %2433 = vmatmul.mubr.f32.vlgmr.msra.gmra.mrb[8].mxu0 %v2365_v33 }
 0x5e3   : > { %2976 = vmatmul.mubr.msk.f32.vlgmr.msra.gmra.mrb[4].mxu1 %vm1024_vm5, %v1102_v39 }
 0x6b3   : > { %v2771_v14 = vpop.f32.mrb[8].mxu0 }
 0x6b4   : > { %v2772_v21 = vpop.f32.mrb[9].mxu0 }
 0x6b5   : > { %v2773_v22 = vadd.f32 %v2772_v21, %v2771_v14 }
 0x6b6   : > { %v2577_v1 = vpop.f32.mrb[4].mxu1 }
 0x6b7   : > { %v3150_v37 = vadd.f32 %v2773_v22, %v2577_v1  ;;  %v2977_v47 = vpop.f32.mrb[5].mxu1 }
 0x6b9   : > { %2582 = vrot.lane.b32.xlu1 %v3150_v37, %s3308_s17 }
 0x72b   : > { %v2583_v25 = vpop.permute.xlu1 %2582 }
 0x72c   : > { %2586 = vst.msk [vmem:[%s3678_s24] sm:$0xff] %vm2585_vm0, %v2583_v25 }
 0x72d   : > { %3252 = shalt.err (!%p3249_p3)
}
 0x72e   : > { %s3253_s24 = scalar_lea.hbm %s4100_s22, 128  ;;  %s3257_s23 = scalar_lea.hbm %s4154_s9, 256 }
 0x72f   : > { %p3254_p4 = scmp.ne.s32.totalorder %s4100_s22, %s3253_s24  ;;  %p3258_p9 = scmp.lt.u32.totalorder %s4100_s22, %s4154_s9 }
 0x730   : > { %p3259_p10 = scmp.lt.u32.totalorder %s3257_s23, %s3253_s24  ;;  %p3261_p12 = scmp.lt.u32.totalorder %s3253_s24, %s4100_s22 }
 0x731   : > { %p3255_p7 = pnand %p3254_p4, %p3398_p5 }
 0x732   : > { %p3260_p11 = por %p3259_p10, %p3258_p9 }
 0x733   : > { %p3256_p8 = pneg %p3255_p7 }
 0x734   : > { %p3262_p13 = por %p3261_p12, %p3260_p11 }
 0x736   : > { %p3263_p0 = pnand %p3262_p13, %p3256_p8 }
 0x738   : > { %3266 = shalt.err (!%p3263_p0)
}
 0x739   : > { %3181 = dma.vmem_to_hbm [thread:$0]  (%p3398_p5), %s4102_s16, 128, %s4100_s22, %s2588_s14  }
 0x73a PF: > { %p3187_p1 = scmp.ge.s32.totalorder %s3301_s12, 2  ;;  %s2613_s26 = sand.u32 1, %s3289_s30  }
 0x73b   : > { %s2614_s13 = scalar_lea.sflag [#allocation3], %s2613_s26 }
 0x73c   : > { %p3184_p2 = pnand %p3187_p1, %p3402_p6 }
 0x73e   : > { %3284 = dma.done.wait (!%p3184_p2), %s2614_s13, 128  }
 0x73f   : > { %3286 = vsyncadd (!%p3184_p2), %s2614_s13, 4294967168  ;;  %p19_p3 = scmp.ge.s32.totalorder %s3385_s15, 4   ;;  %s4166_s30 = smov %s3293_s10 }
 0x740   : > { %s4167_s10 = smov %s3297_s11  ;;  %s4168_s11 = smov %s3396_s18 }
 0x741   : > { %s4169_s12 = smov %s3385_s15  ;;  %21 = sbr.rel (!%p19_p3) target bundleno = 3 (0x3), region = 91 }
 0x748   :  { %2619 = vsyncpa [#allocation3], 1 }
 0x749   :  { %2621 = vsyncpa [#allocation3 + $0x1], 1 }

</bundles_post_ra>
